<compile_context>
chip_gen: v6e
topology: v6e:2x2x1
jax: 0.10.0
libtpu: 0.0.40
codegen_flags: <defaults>
</compile_context>

<pallas_src>
import functools

import jax
import jax.numpy as jnp
from jax import lax
from jax.experimental import pallas as pl
from jax.experimental.pallas import tpu as pltpu

HID = 8            # hidden channels of the synthetic 1x1-conv registration net
DISP_SCALE = 0.05  # displacement magnitude in normalized physical coordinates
LANE = 128


# ---------------------------------------------------------------------------
# small helpers
# ---------------------------------------------------------------------------
def _round_up(x, m):
    return ((x + m - 1) // m) * m


@functools.lru_cache(maxsize=None)
def _vmem_limit_bytes():
    """Generation-aware scoped-VMEM request: ~3/4 of physical VMEM, capped at
    96 MiB (128 MiB parts -> 96 MiB; v7x 64 MiB part -> 48 MiB).  Conservative
    fallback if the introspection API is unavailable."""
    try:
        cap = int(pltpu.get_tpu_info().vmem_capacity_bytes)
        return min(96 << 20, (cap * 3) // 4)
    except Exception:
        return 48 << 20


def _choose_tp(P, *, rows_f32, fixed_bytes, vmem_limit, cap=2048):
    """Largest lane-aligned P-tile (<= cap lanes) whose tp-proportional working
    set (in-kernel f32 row temporaries + double-buffered per-tile blocks,
    expressed as rows_f32 rows of 4*tp bytes) fits the scoped-VMEM budget left
    after the resident double-buffered blocks.  No divisibility requirement:
    the grid uses pl.cdiv and the kernels mask the tail lanes."""
    budget = max(1 << 20, (vmem_limit * 17) // 20 - fixed_bytes)
    tp = max(LANE, min(cap, _round_up(P, LANE)))
    tp -= tp % LANE
    while tp > LANE and rows_f32 * tp * 4 > budget:
        tp -= LANE
    return tp


def _fold_lanes(v, tp):
    """(1, tp) -> (1, 128): sum aligned 128-lane chunks (pure VPU adds, no XLU
    cross-lane reduce).  The final 128-lane sum happens once in JAX."""
    acc = v[:, 0:LANE]
    for k in range(1, tp // LANE):
        acc = acc + v[:, k * LANE:(k + 1) * LANE]
    return acc


def _row_iota(n, tp):
    return lax.broadcasted_iota(jnp.int32, (n, tp), 0).astype(jnp.float32)


# ---------------------------------------------------------------------------
# Kernel A: registration net (both directions) + fused bilinear warp +
#           analytic in-bounds mask + masked-SSD similarity (both directions)
#           + transform-magnitude partial sums.
#   1x1 convs run on the VPU (K=2/K=8 would underfill the MXU); tanh rides the
#   EUP; each warp is one bf16 (H,W)@(W,tp) MXU matmul against an already-bf16
#   resident image block plus a wy-weighted sublane reduce.
# ---------------------------------------------------------------------------
def _regis_sim_kernel(a_res_ref, b_res_ref, a_ref, b_ref, id_ref,
                      w1_ref, b1_ref, w2t_ref, b2_ref,
                      d_ref, sim_ref, tmag_ref, *, H, W, P, tp):
    pt = pl.program_id(1)
    lane = lax.broadcasted_iota(jnp.int32, (1, tp), 1)
    valid = (pt * tp + lane) < P                     # tail-tile mask (cdiv grid)

    a = a_ref[0]                                     # (1, tp) f32
    b = b_ref[0]
    id_y = id_ref[0, 0:1, :]
    id_x = id_ref[0, 1:2, :]

    w1 = w1_ref[...]                                 # (HID, 2)
    b1 = b1_ref[...]                                 # (HID, 1)
    w2t = w2t_ref[...]                               # (HID, 2) pre-transposed
    b2 = b2_ref[...]                                 # (2, 1)

    def net(x, y):
        h = jnp.tanh(w1[:, 0:1] * x + w1[:, 1:2] * y + b1)             # (HID, tp)
        dy = jnp.sum(w2t[:, 0:1] * h, axis=0, keepdims=True) + b2[0:1, 0:1]
        dx = jnp.sum(w2t[:, 1:2] * h, axis=0, keepdims=True) + b2[1:2, 0:1]
        return DISP_SCALE * dy, DISP_SCALE * dx                        # (1, tp)

    ab_y, ab_x = net(a, b)       # D_AB
    ba_y, ba_x = net(b, a)       # D_BA

    # Single dense (4, tp) bf16 store: the only HBM materialization of D,
    # laid out so kernel B can use it directly as its resident (4H, W) MXU LHS.
    d_ref[0, :, :] = jnp.concatenate([ab_y, ab_x, ba_y, ba_x],
                                     axis=0).astype(jnp.bfloat16)

    # hoisted iotas, shared by both warp directions
    iota_h = _row_iota(H, tp)
    iota_w = _row_iota(W, tp)

    def sim_terms(img_res_bf, d_y, d_x, tgt):
        fy = jnp.clip((id_y + d_y) * H, 0.0, H - 1.0)
        fx = jnp.clip((id_x + d_x) * W, 0.0, W - 1.0)
        wy = jnp.maximum(0.0, 1.0 - jnp.abs(iota_h - fy))              # (H, tp)
        wx = jnp.maximum(0.0, 1.0 - jnp.abs(iota_w - fx))              # (W, tp)
        # TODO(synk): band-limit LHS rows / wy with pl.ds once a static
        # displacement bound is available (cuts O(H*W*tp) MXU work for big H).
        t = jnp.dot(img_res_bf, wx.astype(jnp.bfloat16),
                    preferred_element_type=jnp.float32)                # (H, tp)
        warped = jnp.sum(wy * t, axis=0, keepdims=True)                # (1, tp)
        # analytic warp of the separable interior-ones tag (1-pixel zero border)
        my = 1.0 - jnp.maximum(0.0, 1.0 - fy) - jnp.maximum(0.0, fy - (H - 2.0))
        mx = 1.0 - jnp.maximum(0.0, 1.0 - fx) - jnp.maximum(0.0, fx - (W - 2.0))
        diff = warped - tgt
        return my * mx * diff * diff                                   # (1, tp)

    s_ab = sim_terms(a_res_ref[0], ab_y, ab_x, b)   # warp(A, phi_AB) vs B
    s_ba = sim_terms(b_res_ref[0], ba_y, ba_x, a)   # warp(B, phi_BA) vs A
    sim_contrib = _fold_lanes(jnp.where(valid, s_ab + s_ba, 0.0), tp)
    # transform_magnitude = mean((id - phi_AB(id))^2) = mean(D_AB^2)
    tmag_contrib = _fold_lanes(
        jnp.where(valid, ab_y * ab_y + ab_x * ab_x, 0.0), tp)

    @pl.when(pt == 0)
    def _():
        sim_ref[...] = jnp.zeros_like(sim_ref)
        tmag_ref[...] = jnp.zeros_like(tmag_ref)
    sim_ref[0:1, :] += sim_contrib
    tmag_ref[0:1, :] += tmag_contrib


def regis_and_similarity(a_res, b_res, a_flat, b_flat, id_flat, w1, b1, w2t, b2):
    """Returns D (B,4,P) bf16 = [D_AB_y, D_AB_x, D_BA_y, D_BA_x], masked-SSD
    similarity partial sums (B*8,128) and transform-magnitude partials (B*8,128)."""
    B, H, W = a_res.shape
    P = H * W
    vmem_limit = _vmem_limit_bytes()
    rows = 5 * H + 4 * W + 2 * HID + 64               # tp-proportional working set
    fixed = 2 * (H * W * 2) * 2 + (1 << 20)           # 2 bf16 residents, x2 buffers
    tp = _choose_tp(P, rows_f32=rows, fixed_bytes=fixed, vmem_limit=vmem_limit)
    npt = pl.cdiv(P, tp)

    res_spec = pl.BlockSpec((1, H, W), lambda bb, pt: (bb, 0, 0))      # resident

    def tile(c):
        return pl.BlockSpec((1, c, tp), lambda bb, pt: (bb, 0, pt))

    def wspec(shape):
        return pl.BlockSpec(shape, lambda bb, pt: (0, 0))

    acc_spec = pl.BlockSpec((8, LANE), lambda bb, pt: (bb, 0))

    return pl.pallas_call(
        functools.partial(_regis_sim_kernel, H=H, W=W, P=P, tp=tp),
        out_shape=(jax.ShapeDtypeStruct((B, 4, P), jnp.bfloat16),
                   jax.ShapeDtypeStruct((B * 8, LANE), jnp.float32),
                   jax.ShapeDtypeStruct((B * 8, LANE), jnp.float32)),
        grid=(B, npt),
        in_specs=[res_spec, res_spec, tile(1), tile(1), tile(2),
                  wspec((HID, 2)), wspec((HID, 1)), wspec((HID, 2)),
                  wspec((2, 1))],
        out_specs=(tile(4), acc_spec, acc_spec),
        compiler_params=pltpu.CompilerParams(
            dimension_semantics=("parallel", "arbitrary"),
            vmem_limit_bytes=vmem_limit),
    )(a_res, b_res, a_flat, b_flat, id_flat, w1, b1, w2t, b2)


# ---------------------------------------------------------------------------
# Kernel B: fused inverse-consistency composition + SSD.
#   With phi(x) = x + warp(D, x) and Ieps = id + noise:
#     Ieps - phi_AB(phi_BA(Ieps)) = -(warp(D_BA,Ieps) + warp(D_AB, Ieps+warp(D_BA,Ieps)))
#     Ieps - phi_BA(phi_AB(Ieps)) = -(warp(D_AB,Ieps) + warp(D_BA, Ieps+warp(D_AB,Ieps)))
#   The single bf16 (4H, W) displacement block stays resident across P-tiles;
#   the two warps at Ieps share one weight set and one MXU call.
# ---------------------------------------------------------------------------
def _ic_kernel(d_ref, id_ref, noise_ref, out_ref, *, H, W, P, tp):
    pt = pl.program_id(1)
    lane = lax.broadcasted_iota(jnp.int32, (1, tp), 1)
    valid = (pt * tp + lane) < P

    iota_h = _row_iota(H, tp)        # hoisted, shared by all 3 weight sets
    iota_w = _row_iota(W, tp)

    def weights(cy, cx):
        fy = jnp.clip(cy * H, 0.0, H - 1.0)
        fx = jnp.clip(cx * W, 0.0, W - 1.0)
        wy = jnp.maximum(0.0, 1.0 - jnp.abs(iota_h - fy))              # (H, tp)
        wx = jnp.maximum(0.0, 1.0 - jnp.abs(iota_w - fx))              # (W, tp)
        return wy, wx.astype(jnp.bfloat16)

    def warp(lhs_bf, wy, wx_bf):
        # n channels stacked on the MXU M dimension: (n*H, W) @ (W, tp)
        t = jnp.dot(lhs_bf, wx_bf, preferred_element_type=jnp.float32)
        n = lhs_bf.shape[0] // H
        return [jnp.sum(wy * t[c * H:(c + 1) * H], axis=0, keepdims=True)
                for c in range(n)]

    # Iepsilon = identityMap + noise (fused elementwise add)
    ey = id_ref[0, 0:1, :] + noise_ref[0, 0:1, :]
    ex = id_ref[0, 1:2, :] + noise_ref[0, 1:2, :]

    # shared-coordinate warp of BOTH fields: one (4H, W) @ (W, tp) matmul
    wy0, wx0 = weights(ey, ex)
    ab_y, ab_x, ba_y, ba_x = warp(d_ref[0], wy0, wx0)

    # chain 1 folded immediately so its temporaries die before chain 2 is built
    wy1, wx1 = weights(ey + ba_y, ex + ba_x)
    a1_y, a1_x = warp(d_ref[0, 0:2 * H, :], wy1, wx1)       # D_AB rows
    e1y = ba_y + a1_y
    e1x = ba_x + a1_x
    sq = e1y * e1y + e1x * e1x

    # chain 2
    wy2, wx2 = weights(ey + ab_y, ex + ab_x)
    b2_y, b2_x = warp(d_ref[0, 2 * H:4 * H, :], wy2, wx2)   # D_BA rows
    e2y = ab_y + b2_y
    e2x = ab_x + b2_x
    sq = sq + e2y * e2y + e2x * e2x

    contrib = _fold_lanes(jnp.where(valid, sq, 0.0), tp)

    @pl.when(pt == 0)
    def _():
        out_ref[...] = jnp.zeros_like(out_ref)
    out_ref[0:1, :] += contrib


def inverse_consistency_partials(d_img, id_flat, noise_flat):
    """d_img (B, 4H, W) bf16 = [D_AB_y; D_AB_x; D_BA_y; D_BA_x] stacked on rows;
    id/noise (B, 2, P) f32 -> partial sums (B*8, 128) f32."""
    B, H4, W = d_img.shape
    H = H4 // 4
    P = H * W
    vmem_limit = _vmem_limit_bytes()
    rows = 12 * H + 5 * W + 64
    fixed = (4 * H * W * 2) * 2 + (1 << 20)       # bf16 resident D, x2 buffers
    # cap=512: bounds vreg pressure from the many (1,tp) temporaries
    tp = _choose_tp(P, rows_f32=rows, fixed_bytes=fixed,
                    vmem_limit=vmem_limit, cap=512)
    npt = pl.cdiv(P, tp)
    # TODO(synk): when B == 1, split P over an extra "parallel" axis so both
    # v7x TensorCores are busy.
    return pl.pallas_call(
        functools.partial(_ic_kernel, H=H, W=W, P=P, tp=tp),
        out_shape=jax.ShapeDtypeStruct((B * 8, LANE), jnp.float32),
        grid=(B, npt),
        in_specs=[
            pl.BlockSpec((1, 4 * H, W), lambda bb, pt: (bb, 0, 0)),    # resident
            pl.BlockSpec((1, 2, tp), lambda bb, pt: (bb, 0, pt)),
            pl.BlockSpec((1, 2, tp), lambda bb, pt: (bb, 0, pt)),
        ],
        out_specs=pl.BlockSpec((8, LANE), lambda bb, pt: (bb, 0)),
        compiler_params=pltpu.CompilerParams(
            dimension_semantics=("parallel", "arbitrary"),
            vmem_limit_bytes=vmem_limit),
    )(d_img, id_flat, noise_flat)


# ---------------------------------------------------------------------------
# flips() — for 2-D registration (4-D phi) the torch reference returns -1.
# ---------------------------------------------------------------------------
def flips(phi_nchw):
    if phi_nchw.ndim == 5:
        # TODO(synk): 3-D folded-voxel count (cross product of finite diffs)
        # is not exercised by this 2-D configuration.
        raise NotImplementedError
    return jnp.float32(-1.0)


# ---------------------------------------------------------------------------
# InverseConsistentNet.forward
# ---------------------------------------------------------------------------
@jax.jit
def inverse_consistent_forward(image_A, image_B, params, identity_map, noise,
                               lmbda):
    B, _, H, W = image_A.shape
    P = H * W
    w1, b1, w2t, b2 = params

    # bf16 resident copies cast ONCE here (not per grid step inside kernels)
    a_res = image_A.reshape(B, H, W).astype(jnp.bfloat16)
    b_res = image_B.reshape(B, H, W).astype(jnp.bfloat16)
    a_f = image_A.reshape(B, 1, P)
    b_f = image_B.reshape(B, 1, P)
    id_f = identity_map.reshape(B, 2, P)

    # Kernel A: regis net (both dirs) + masked-SSD similarity + tmag partials.
    d_all, sim_part, tmag_part = regis_and_similarity(
        a_res, b_res, a_f, b_f, id_f, w1, b1, w2t, b2)

    similarity_loss = jnp.sum(sim_part) / (B * 1 * P)
    # mean((identityMap - phi_AB_vectorfield)^2) == mean(D_AB^2)
    transform_magnitude = jnp.sum(tmag_part) / (B * 2 * P)

    # Kernel B: fused composition + inverse-consistency SSD.
    # (B,4,P) -> (B,4H,W) is a contiguous (free) reshape.
    ic_part = inverse_consistency_partials(
        d_all.reshape(B, 4 * H, W), id_f, noise)
    inverse_consistency_loss = jnp.sum(ic_part) / (B * 2 * P)

    all_loss = lmbda * inverse_consistency_loss + similarity_loss
    # flips() only inspects rank for 2-D registration (returns -1), so the
    # phi_BA vector field never needs to be materialized.
    flips_val = flips(d_all.reshape(B, 4, H, W)[:, 2:4])

    return (all_loss, inverse_consistency_loss, similarity_loss,
            transform_magnitude, flips_val)


if __name__ == "__main__":
    B, H, W = 2, 16, 16
    lmbda = 0.5

    key = jax.random.PRNGKey(0)
    k_a, k_b, k_noise, k1, k2 = jax.random.split(key, 5)
    image_A = jax.random.uniform(k_a, (B, 1, H, W), jnp.float32)
    image_B = jax.random.uniform(k_b, (B, 1, H, W), jnp.float32)

    # Deterministic synthetic registration-net parameters.
    w1 = 0.5 * jax.random.normal(k1, (HID, 2), jnp.float32)
    b1 = jnp.zeros((HID, 1), jnp.float32)
    w2 = 0.5 * jax.random.normal(k2, (2, HID), jnp.float32)
    b2 = jnp.zeros((2, 1), jnp.float32)
    params = (w1, b1, w2.T, b2)   # second-layer weights passed transposed (HID, 2)

    # identityMap & spacing (icon convention: coord[d] = index_d * spacing[d]).
    spacing = (1.0 / H, 1.0 / W)
    ii, jj = jnp.meshgrid(jnp.arange(H, dtype=jnp.float32),
                          jnp.arange(W, dtype=jnp.float32), indexing="ij")
    identity_map = jnp.broadcast_to(
        jnp.stack([ii * spacing[0], jj * spacing[1]], axis=0),
        (B, 2, H, W)).astype(jnp.float32)

    # torch.randn(*identityMap.shape) * 1 / identityMap.shape[-1]
    noise = jax.random.normal(k_noise, (B, 2, H * W), jnp.float32) * (1.0 / W)

    outs = inverse_consistent_forward(image_A, image_B, params, identity_map,
                                      noise, lmbda)
    jax.block_until_ready(outs)
    print("KERNEL_OK")
</pallas_src>

<mosaic_0001>
module attributes {stable_mosaic.version = 11 : i64} {
  func.func @_regis_sim_kernel(%arg0: i32, %arg1: i32, %arg2: memref<1x16x16xbf16, #tpu.memory_space<vmem>>, %arg3: memref<1x16x16xbf16, #tpu.memory_space<vmem>>, %arg4: memref<1x1x256xf32, #tpu.memory_space<vmem>>, %arg5: memref<1x1x256xf32, #tpu.memory_space<vmem>>, %arg6: memref<1x2x256xf32, #tpu.memory_space<vmem>>, %arg7: memref<8x2xf32, #tpu.memory_space<vmem>>, %arg8: memref<8x1xf32, #tpu.memory_space<vmem>>, %arg9: memref<8x2xf32, #tpu.memory_space<vmem>>, %arg10: memref<2x1xf32, #tpu.memory_space<vmem>>, %arg11: memref<1x4x256xbf16, #tpu.memory_space<vmem>>, %arg12: memref<8x128xf32, #tpu.memory_space<vmem>>, %arg13: memref<8x128xf32, #tpu.memory_space<vmem>>) attributes {dimension_semantics = [#tpu.dimension_semantics<parallel>, #tpu.dimension_semantics<arbitrary>], iteration_bounds = array<i64: 2, 1>, scalar_prefetch = 0 : i64, scratch_operands = 0 : i64, tpu.core_type = #tpu.core_type<tc>, window_params = [{transform_indices = @transform_0, window_bounds = array<i64: 1, 16, 16>}, {transform_indices = @transform_1, window_bounds = array<i64: 1, 16, 16>}, {transform_indices = @transform_2, window_bounds = array<i64: 1, 1, 256>}, {transform_indices = @transform_3, window_bounds = array<i64: 1, 1, 256>}, {transform_indices = @transform_4, window_bounds = array<i64: 1, 2, 256>}, {pipeline_mode = #tpu.pipeline_mode<synchronous>, transform_indices = @transform_5, window_bounds = array<i64: 8, 2>}, {pipeline_mode = #tpu.pipeline_mode<synchronous>, transform_indices = @transform_6, window_bounds = array<i64: 8, 1>}, {pipeline_mode = #tpu.pipeline_mode<synchronous>, transform_indices = @transform_7, window_bounds = array<i64: 8, 2>}, {pipeline_mode = #tpu.pipeline_mode<synchronous>, transform_indices = @transform_8, window_bounds = array<i64: 2, 1>}, {transform_indices = @transform_9, window_bounds = array<i64: 1, 4, 256>}, {transform_indices = @transform_10, window_bounds = array<i64: 8, 128>}, {transform_indices = @transform_11, window_bounds = array<i64: 8, 128>}]} {
    %0 = tpu.iota {dimensions = array<i32: 1>} : vector<1x256xi32>
    %c256_i32 = arith.constant 256 : i32
    %1 = arith.muli %arg1, %c256_i32 : i32
    %2 = vector.broadcast %1 : i32 to vector<1x256xi32>
    %3 = arith.addi %2, %0 : vector<1x256xi32>
    %c256_i32_0 = arith.constant 256 : i32
    %4 = vector.broadcast %c256_i32_0 : i32 to vector<1x256xi32>
    %5 = arith.cmpi slt, %3, %4 : vector<1x256xi32>
    %c0 = arith.constant 0 : index
    %c0_1 = arith.constant 0 : index
    %c0_2 = arith.constant 0 : index
    %6 = vector.load %arg4[%c0, %c0_1, %c0_2] : memref<1x1x256xf32, #tpu.memory_space<vmem>>, vector<1x1x256xf32>
    %7 = vector.shape_cast %6 : vector<1x1x256xf32> to vector<1x256xf32>
    %c0_3 = arith.constant 0 : index
    %c0_4 = arith.constant 0 : index
    %c0_5 = arith.constant 0 : index
    %8 = vector.load %arg5[%c0_3, %c0_4, %c0_5] : memref<1x1x256xf32, #tpu.memory_space<vmem>>, vector<1x1x256xf32>
    %9 = vector.shape_cast %8 : vector<1x1x256xf32> to vector<1x256xf32>
    %c0_6 = arith.constant 0 : index
    %c0_7 = arith.constant 0 : index
    %c0_8 = arith.constant 0 : index
    %10 = vector.load %arg6[%c0_6, %c0_7, %c0_8] : memref<1x2x256xf32, #tpu.memory_space<vmem>>, vector<1x1x256xf32>
    %11 = vector.shape_cast %10 : vector<1x1x256xf32> to vector<1x256xf32>
    %c0_9 = arith.constant 0 : index
    %c1 = arith.constant 1 : index
    %c0_10 = arith.constant 0 : index
    %12 = vector.load %arg6[%c0_9, %c1, %c0_10] : memref<1x2x256xf32, #tpu.memory_space<vmem>>, vector<1x1x256xf32>
    %13 = vector.shape_cast %12 : vector<1x1x256xf32> to vector<1x256xf32>
    %c0_11 = arith.constant 0 : index
    %c0_12 = arith.constant 0 : index
    %14 = vector.load %arg7[%c0_11, %c0_12] : memref<8x2xf32, #tpu.memory_space<vmem>>, vector<8x2xf32>
    %c0_13 = arith.constant 0 : index
    %c0_14 = arith.constant 0 : index
    %15 = vector.load %arg8[%c0_13, %c0_14] : memref<8x1xf32, #tpu.memory_space<vmem>>, vector<8x1xf32>
    %c0_15 = arith.constant 0 : index
    %c0_16 = arith.constant 0 : index
    %16 = vector.load %arg9[%c0_15, %c0_16] : memref<8x2xf32, #tpu.memory_space<vmem>>, vector<8x2xf32>
    %c0_17 = arith.constant 0 : index
    %c0_18 = arith.constant 0 : index
    %17 = vector.load %arg10[%c0_17, %c0_18] : memref<2x1xf32, #tpu.memory_space<vmem>>, vector<2x1xf32>
    %18 = vector.extract_strided_slice %14 {offsets = [0, 0], sizes = [8, 1], strides = [1, 1]} : vector<8x2xf32> to vector<8x1xf32>
    %19 = vector.broadcast %18 : vector<8x1xf32> to vector<8x256xf32>
    %20 = vector.broadcast %7 : vector<1x256xf32> to vector<8x256xf32>
    %21 = arith.mulf %19, %20 : vector<8x256xf32>
    %22 = vector.extract_strided_slice %14 {offsets = [0, 1], sizes = [8, 1], strides = [1, 1]} : vector<8x2xf32> to vector<8x1xf32>
    %23 = vector.broadcast %22 : vector<8x1xf32> to vector<8x256xf32>
    %24 = vector.broadcast %9 : vector<1x256xf32> to vector<8x256xf32>
    %25 = arith.mulf %23, %24 : vector<8x256xf32>
    %26 = arith.addf %21, %25 : vector<8x256xf32>
    %27 = vector.broadcast %15 : vector<8x1xf32> to vector<8x256xf32>
    %28 = arith.addf %26, %27 : vector<8x256xf32>
    %29 = math.tanh %28 : vector<8x256xf32>
    %30 = vector.extract_strided_slice %16 {offsets = [0, 0], sizes = [8, 1], strides = [1, 1]} : vector<8x2xf32> to vector<8x1xf32>
    %31 = vector.broadcast %30 : vector<8x1xf32> to vector<8x256xf32>
    %32 = arith.mulf %31, %29 : vector<8x256xf32>
    %cst = arith.constant dense<0.000000e+00> : vector<256xf32>
    %33 = vector.multi_reduction <add>, %32, %cst [0] : vector<8x256xf32> to vector<256xf32>
    %34 = vector.shape_cast %33 : vector<256xf32> to vector<1x256xf32>
    %35 = vector.extract_strided_slice %17 {offsets = [0, 0], sizes = [1, 1], strides = [1, 1]} : vector<2x1xf32> to vector<1x1xf32>
    %36 = vector.broadcast %35 : vector<1x1xf32> to vector<1x256xf32>
    %37 = arith.addf %34, %36 : vector<1x256xf32>
    %38 = vector.extract_strided_slice %16 {offsets = [0, 1], sizes = [8, 1], strides = [1, 1]} : vector<8x2xf32> to vector<8x1xf32>
    %39 = vector.broadcast %38 : vector<8x1xf32> to vector<8x256xf32>
    %40 = arith.mulf %39, %29 : vector<8x256xf32>
    %cst_19 = arith.constant dense<0.000000e+00> : vector<256xf32>
    %41 = vector.multi_reduction <add>, %40, %cst_19 [0] : vector<8x256xf32> to vector<256xf32>
    %42 = vector.shape_cast %41 : vector<256xf32> to vector<1x256xf32>
    %43 = vector.extract_strided_slice %17 {offsets = [1, 0], sizes = [1, 1], strides = [1, 1]} : vector<2x1xf32> to vector<1x1xf32>
    %44 = vector.broadcast %43 : vector<1x1xf32> to vector<1x256xf32>
    %45 = arith.addf %42, %44 : vector<1x256xf32>
    %cst_20 = arith.constant 5.000000e-02 : f32
    %46 = vector.broadcast %cst_20 : f32 to vector<1x256xf32>
    %47 = arith.mulf %46, %37 : vector<1x256xf32>
    %cst_21 = arith.constant 5.000000e-02 : f32
    %48 = vector.broadcast %cst_21 : f32 to vector<1x256xf32>
    %49 = arith.mulf %48, %45 : vector<1x256xf32>
    %50 = vector.extract_strided_slice %14 {offsets = [0, 0], sizes = [8, 1], strides = [1, 1]} : vector<8x2xf32> to vector<8x1xf32>
    %51 = vector.broadcast %50 : vector<8x1xf32> to vector<8x256xf32>
    %52 = vector.broadcast %9 : vector<1x256xf32> to vector<8x256xf32>
    %53 = arith.mulf %51, %52 : vector<8x256xf32>
    %54 = vector.extract_strided_slice %14 {offsets = [0, 1], sizes = [8, 1], strides = [1, 1]} : vector<8x2xf32> to vector<8x1xf32>
    %55 = vector.broadcast %54 : vector<8x1xf32> to vector<8x256xf32>
    %56 = vector.broadcast %7 : vector<1x256xf32> to vector<8x256xf32>
    %57 = arith.mulf %55, %56 : vector<8x256xf32>
    %58 = arith.addf %53, %57 : vector<8x256xf32>
    %59 = vector.broadcast %15 : vector<8x1xf32> to vector<8x256xf32>
    %60 = arith.addf %58, %59 : vector<8x256xf32>
    %61 = math.tanh %60 : vector<8x256xf32>
    %62 = vector.extract_strided_slice %16 {offsets = [0, 0], sizes = [8, 1], strides = [1, 1]} : vector<8x2xf32> to vector<8x1xf32>
    %63 = vector.broadcast %62 : vector<8x1xf32> to vector<8x256xf32>
    %64 = arith.mulf %63, %61 : vector<8x256xf32>
    %cst_22 = arith.constant dense<0.000000e+00> : vector<256xf32>
    %65 = vector.multi_reduction <add>, %64, %cst_22 [0] : vector<8x256xf32> to vector<256xf32>
    %66 = vector.shape_cast %65 : vector<256xf32> to vector<1x256xf32>
    %67 = vector.extract_strided_slice %17 {offsets = [0, 0], sizes = [1, 1], strides = [1, 1]} : vector<2x1xf32> to vector<1x1xf32>
    %68 = vector.broadcast %67 : vector<1x1xf32> to vector<1x256xf32>
    %69 = arith.addf %66, %68 : vector<1x256xf32>
    %70 = vector.extract_strided_slice %16 {offsets = [0, 1], sizes = [8, 1], strides = [1, 1]} : vector<8x2xf32> to vector<8x1xf32>
    %71 = vector.broadcast %70 : vector<8x1xf32> to vector<8x256xf32>
    %72 = arith.mulf %71, %61 : vector<8x256xf32>
    %cst_23 = arith.constant dense<0.000000e+00> : vector<256xf32>
    %73 = vector.multi_reduction <add>, %72, %cst_23 [0] : vector<8x256xf32> to vector<256xf32>
    %74 = vector.shape_cast %73 : vector<256xf32> to vector<1x256xf32>
    %75 = vector.extract_strided_slice %17 {offsets = [1, 0], sizes = [1, 1], strides = [1, 1]} : vector<2x1xf32> to vector<1x1xf32>
    %76 = vector.broadcast %75 : vector<1x1xf32> to vector<1x256xf32>
    %77 = arith.addf %74, %76 : vector<1x256xf32>
    %cst_24 = arith.constant 5.000000e-02 : f32
    %78 = vector.broadcast %cst_24 : f32 to vector<1x256xf32>
    %79 = arith.mulf %78, %69 : vector<1x256xf32>
    %cst_25 = arith.constant 5.000000e-02 : f32
    %80 = vector.broadcast %cst_25 : f32 to vector<1x256xf32>
    %81 = arith.mulf %80, %77 : vector<1x256xf32>
    %82 = tpu.concatenate %47, %49, %79, %81 in 0 : vector<1x256xf32>, vector<1x256xf32>, vector<1x256xf32>, vector<1x256xf32> -> vector<4x256xf32>
    %83 = arith.truncf %82 : vector<4x256xf32> to vector<4x256xbf16>
    %c0_26 = arith.constant 0 : index
    %c0_27 = arith.constant 0 : index
    %c0_28 = arith.constant 0 : index
    %84 = vector.load %arg11[%c0_26, %c0_27, %c0_28] : memref<1x4x256xbf16, #tpu.memory_space<vmem>>, vector<1x4x256xbf16>
    %85 = vector.shape_cast %84 : vector<1x4x256xbf16> to vector<4x256xbf16>
    %86 = vector.shape_cast %83 : vector<4x256xbf16> to vector<1x4x256xbf16>
    tpu.vector_store %arg11[%c0_26, %c0_27, %c0_28], %86 {strides = array<i32>} : memref<1x4x256xbf16, #tpu.memory_space<vmem>>, vector<1x4x256xbf16>,
    %87 = tpu.iota {dimensions = array<i32: 0>} : vector<16x256xi32>
    %88 = arith.sitofp %87 : vector<16x256xi32> to vector<16x256xf32>
    %89 = tpu.iota {dimensions = array<i32: 0>} : vector<16x256xi32>
    %90 = arith.sitofp %89 : vector<16x256xi32> to vector<16x256xf32>
    %c0_29 = arith.constant 0 : index
    %c0_30 = arith.constant 0 : index
    %c0_31 = arith.constant 0 : index
    %91 = vector.load %arg2[%c0_29, %c0_30, %c0_31] : memref<1x16x16xbf16, #tpu.memory_space<vmem>>, vector<1x16x16xbf16>
    %92 = vector.shape_cast %91 : vector<1x16x16xbf16> to vector<16x16xbf16>
    %93 = arith.addf %11, %47 : vector<1x256xf32>
    %cst_32 = arith.constant 1.600000e+01 : f32
    %94 = vector.broadcast %cst_32 : f32 to vector<1x256xf32>
    %95 = arith.mulf %93, %94 : vector<1x256xf32>
    %cst_33 = arith.constant 0.000000e+00 : f32
    %cst_34 = arith.constant 1.500000e+01 : f32
    %96 = vector.broadcast %cst_33 : f32 to vector<1x256xf32>
    %97 = arith.maximumf %96, %95 : vector<1x256xf32>
    %98 = vector.broadcast %cst_34 : f32 to vector<1x256xf32>
    %99 = arith.minimumf %98, %97 : vector<1x256xf32>
    %100 = arith.addf %13, %49 : vector<1x256xf32>
    %cst_35 = arith.constant 1.600000e+01 : f32
    %101 = vector.broadcast %cst_35 : f32 to vector<1x256xf32>
    %102 = arith.mulf %100, %101 : vector<1x256xf32>
    %cst_36 = arith.constant 0.000000e+00 : f32
    %cst_37 = arith.constant 1.500000e+01 : f32
    %103 = vector.broadcast %cst_36 : f32 to vector<1x256xf32>
    %104 = arith.maximumf %103, %102 : vector<1x256xf32>
    %105 = vector.broadcast %cst_37 : f32 to vector<1x256xf32>
    %106 = arith.minimumf %105, %104 : vector<1x256xf32>
    %107 = vector.broadcast %99 : vector<1x256xf32> to vector<16x256xf32>
    %108 = arith.subf %88, %107 : vector<16x256xf32>
    %109 = math.absf %108 : vector<16x256xf32>
    %cst_38 = arith.constant 1.000000e+00 : f32
    %110 = vector.broadcast %cst_38 : f32 to vector<16x256xf32>
    %111 = arith.subf %110, %109 : vector<16x256xf32>
    %cst_39 = arith.constant 0.000000e+00 : f32
    %112 = vector.broadcast %cst_39 : f32 to vector<16x256xf32>
    %113 = arith.maximumf %112, %111 : vector<16x256xf32>
    %114 = vector.broadcast %106 : vector<1x256xf32> to vector<16x256xf32>
    %115 = arith.subf %90, %114 : vector<16x256xf32>
    %116 = math.absf %115 : vector<16x256xf32>
    %cst_40 = arith.constant 1.000000e+00 : f32
    %117 = vector.broadcast %cst_40 : f32 to vector<16x256xf32>
    %118 = arith.subf %117, %116 : vector<16x256xf32>
    %cst_41 = arith.constant 0.000000e+00 : f32
    %119 = vector.broadcast %cst_41 : f32 to vector<16x256xf32>
    %120 = arith.maximumf %119, %118 : vector<16x256xf32>
    %121 = arith.truncf %120 : vector<16x256xf32> to vector<16x256xbf16>
    %cst_42 = arith.constant dense<0.000000e+00> : vector<16x256xf32>
    %122 = tpu.matmul %92, %121, %cst_42 {dimension_numbers = #tpu.dot_dimension_numbers<[1], [0], [0], [1], [0, 0, 1, 1], [], []>} : vector<16x16xbf16>, vector<16x256xbf16>, vector<16x256xf32> -> vector<16x256xf32>
    %123 = arith.mulf %113, %122 : vector<16x256xf32>
    %cst_43 = arith.constant dense<0.000000e+00> : vector<256xf32>
    %124 = vector.multi_reduction <add>, %123, %cst_43 [0] : vector<16x256xf32> to vector<256xf32>
    %125 = vector.shape_cast %124 : vector<256xf32> to vector<1x256xf32>
    %cst_44 = arith.constant 1.000000e+00 : f32
    %126 = vector.broadcast %cst_44 : f32 to vector<1x256xf32>
    %127 = arith.subf %126, %99 : vector<1x256xf32>
    %cst_45 = arith.constant 0.000000e+00 : f32
    %128 = vector.broadcast %cst_45 : f32 to vector<1x256xf32>
    %129 = arith.maximumf %128, %127 : vector<1x256xf32>
    %cst_46 = arith.constant 1.000000e+00 : f32
    %130 = vector.broadcast %cst_46 : f32 to vector<1x256xf32>
    %131 = arith.subf %130, %129 : vector<1x256xf32>
    %cst_47 = arith.constant 1.400000e+01 : f32
    %132 = vector.broadcast %cst_47 : f32 to vector<1x256xf32>
    %133 = arith.subf %99, %132 : vector<1x256xf32>
    %cst_48 = arith.constant 0.000000e+00 : f32
    %134 = vector.broadcast %cst_48 : f32 to vector<1x256xf32>
    %135 = arith.maximumf %134, %133 : vector<1x256xf32>
    %136 = arith.subf %131, %135 : vector<1x256xf32>
    %cst_49 = arith.constant 1.000000e+00 : f32
    %137 = vector.broadcast %cst_49 : f32 to vector<1x256xf32>
    %138 = arith.subf %137, %106 : vector<1x256xf32>
    %cst_50 = arith.constant 0.000000e+00 : f32
    %139 = vector.broadcast %cst_50 : f32 to vector<1x256xf32>
    %140 = arith.maximumf %139, %138 : vector<1x256xf32>
    %cst_51 = arith.constant 1.000000e+00 : f32
    %141 = vector.broadcast %cst_51 : f32 to vector<1x256xf32>
    %142 = arith.subf %141, %140 : vector<1x256xf32>
    %cst_52 = arith.constant 1.400000e+01 : f32
    %143 = vector.broadcast %cst_52 : f32 to vector<1x256xf32>
    %144 = arith.subf %106, %143 : vector<1x256xf32>
    %cst_53 = arith.constant 0.000000e+00 : f32
    %145 = vector.broadcast %cst_53 : f32 to vector<1x256xf32>
    %146 = arith.maximumf %145, %144 : vector<1x256xf32>
    %147 = arith.subf %142, %146 : vector<1x256xf32>
    %148 = arith.subf %125, %9 : vector<1x256xf32>
    %149 = arith.mulf %136, %147 : vector<1x256xf32>
    %150 = arith.mulf %149, %148 : vector<1x256xf32>
    %151 = arith.mulf %150, %148 : vector<1x256xf32>
    %c0_54 = arith.constant 0 : index
    %c0_55 = arith.constant 0 : index
    %c0_56 = arith.constant 0 : index
    %152 = vector.load %arg3[%c0_54, %c0_55, %c0_56] : memref<1x16x16xbf16, #tpu.memory_space<vmem>>, vector<1x16x16xbf16>
    %153 = vector.shape_cast %152 : vector<1x16x16xbf16> to vector<16x16xbf16>
    %154 = arith.addf %11, %79 : vector<1x256xf32>
    %cst_57 = arith.constant 1.600000e+01 : f32
    %155 = vector.broadcast %cst_57 : f32 to vector<1x256xf32>
    %156 = arith.mulf %154, %155 : vector<1x256xf32>
    %cst_58 = arith.constant 0.000000e+00 : f32
    %cst_59 = arith.constant 1.500000e+01 : f32
    %157 = vector.broadcast %cst_58 : f32 to vector<1x256xf32>
    %158 = arith.maximumf %157, %156 : vector<1x256xf32>
    %159 = vector.broadcast %cst_59 : f32 to vector<1x256xf32>
    %160 = arith.minimumf %159, %158 : vector<1x256xf32>
    %161 = arith.addf %13, %81 : vector<1x256xf32>
    %cst_60 = arith.constant 1.600000e+01 : f32
    %162 = vector.broadcast %cst_60 : f32 to vector<1x256xf32>
    %163 = arith.mulf %161, %162 : vector<1x256xf32>
    %cst_61 = arith.constant 0.000000e+00 : f32
    %cst_62 = arith.constant 1.500000e+01 : f32
    %164 = vector.broadcast %cst_61 : f32 to vector<1x256xf32>
    %165 = arith.maximumf %164, %163 : vector<1x256xf32>
    %166 = vector.broadcast %cst_62 : f32 to vector<1x256xf32>
    %167 = arith.minimumf %166, %165 : vector<1x256xf32>
    %168 = vector.broadcast %160 : vector<1x256xf32> to vector<16x256xf32>
    %169 = arith.subf %88, %168 : vector<16x256xf32>
    %170 = math.absf %169 : vector<16x256xf32>
    %cst_63 = arith.constant 1.000000e+00 : f32
    %171 = vector.broadcast %cst_63 : f32 to vector<16x256xf32>
    %172 = arith.subf %171, %170 : vector<16x256xf32>
    %cst_64 = arith.constant 0.000000e+00 : f32
    %173 = vector.broadcast %cst_64 : f32 to vector<16x256xf32>
    %174 = arith.maximumf %173, %172 : vector<16x256xf32>
    %175 = vector.broadcast %167 : vector<1x256xf32> to vector<16x256xf32>
    %176 = arith.subf %90, %175 : vector<16x256xf32>
    %177 = math.absf %176 : vector<16x256xf32>
    %cst_65 = arith.constant 1.000000e+00 : f32
    %178 = vector.broadcast %cst_65 : f32 to vector<16x256xf32>
    %179 = arith.subf %178, %177 : vector<16x256xf32>
    %cst_66 = arith.constant 0.000000e+00 : f32
    %180 = vector.broadcast %cst_66 : f32 to vector<16x256xf32>
    %181 = arith.maximumf %180, %179 : vector<16x256xf32>
    %182 = arith.truncf %181 : vector<16x256xf32> to vector<16x256xbf16>
    %cst_67 = arith.constant dense<0.000000e+00> : vector<16x256xf32>
    %183 = tpu.matmul %153, %182, %cst_67 {dimension_numbers = #tpu.dot_dimension_numbers<[1], [0], [0], [1], [0, 0, 1, 1], [], []>} : vector<16x16xbf16>, vector<16x256xbf16>, vector<16x256xf32> -> vector<16x256xf32>
    %184 = arith.mulf %174, %183 : vector<16x256xf32>
    %cst_68 = arith.constant dense<0.000000e+00> : vector<256xf32>
    %185 = vector.multi_reduction <add>, %184, %cst_68 [0] : vector<16x256xf32> to vector<256xf32>
    %186 = vector.shape_cast %185 : vector<256xf32> to vector<1x256xf32>
    %cst_69 = arith.constant 1.000000e+00 : f32
    %187 = vector.broadcast %cst_69 : f32 to vector<1x256xf32>
    %188 = arith.subf %187, %160 : vector<1x256xf32>
    %cst_70 = arith.constant 0.000000e+00 : f32
    %189 = vector.broadcast %cst_70 : f32 to vector<1x256xf32>
    %190 = arith.maximumf %189, %188 : vector<1x256xf32>
    %cst_71 = arith.constant 1.000000e+00 : f32
    %191 = vector.broadcast %cst_71 : f32 to vector<1x256xf32>
    %192 = arith.subf %191, %190 : vector<1x256xf32>
    %cst_72 = arith.constant 1.400000e+01 : f32
    %193 = vector.broadcast %cst_72 : f32 to vector<1x256xf32>
    %194 = arith.subf %160, %193 : vector<1x256xf32>
    %cst_73 = arith.constant 0.000000e+00 : f32
    %195 = vector.broadcast %cst_73 : f32 to vector<1x256xf32>
    %196 = arith.maximumf %195, %194 : vector<1x256xf32>
    %197 = arith.subf %192, %196 : vector<1x256xf32>
    %cst_74 = arith.constant 1.000000e+00 : f32
    %198 = vector.broadcast %cst_74 : f32 to vector<1x256xf32>
    %199 = arith.subf %198, %167 : vector<1x256xf32>
    %cst_75 = arith.constant 0.000000e+00 : f32
    %200 = vector.broadcast %cst_75 : f32 to vector<1x256xf32>
    %201 = arith.maximumf %200, %199 : vector<1x256xf32>
    %cst_76 = arith.constant 1.000000e+00 : f32
    %202 = vector.broadcast %cst_76 : f32 to vector<1x256xf32>
    %203 = arith.subf %202, %201 : vector<1x256xf32>
    %cst_77 = arith.constant 1.400000e+01 : f32
    %204 = vector.broadcast %cst_77 : f32 to vector<1x256xf32>
    %205 = arith.subf %167, %204 : vector<1x256xf32>
    %cst_78 = arith.constant 0.000000e+00 : f32
    %206 = vector.broadcast %cst_78 : f32 to vector<1x256xf32>
    %207 = arith.maximumf %206, %205 : vector<1x256xf32>
    %208 = arith.subf %203, %207 : vector<1x256xf32>
    %209 = arith.subf %186, %7 : vector<1x256xf32>
    %210 = arith.mulf %197, %208 : vector<1x256xf32>
    %211 = arith.mulf %210, %209 : vector<1x256xf32>
    %212 = arith.mulf %211, %209 : vector<1x256xf32>
    %213 = arith.addf %151, %212 : vector<1x256xf32>
    %cst_79 = arith.constant 0.000000e+00 : f32
    %214 = vector.broadcast %cst_79 : f32 to vector<1x256xf32>
    %215 = arith.select %5, %213, %214 : vector<1x256xi1>, vector<1x256xf32>
    %216 = vector.extract_strided_slice %215 {offsets = [0, 0], sizes = [1, 128], strides = [1, 1]} : vector<1x256xf32> to vector<1x128xf32>
    %217 = vector.extract_strided_slice %215 {offsets = [0, 128], sizes = [1, 128], strides = [1, 1]} : vector<1x256xf32> to vector<1x128xf32>
    %218 = arith.addf %216, %217 : vector<1x128xf32>
    %219 = arith.mulf %47, %47 : vector<1x256xf32>
    %220 = arith.mulf %49, %49 : vector<1x256xf32>
    %221 = arith.addf %219, %220 : vector<1x256xf32>
    %cst_80 = arith.constant 0.000000e+00 : f32
    %222 = vector.broadcast %cst_80 : f32 to vector<1x256xf32>
    %223 = arith.select %5, %221, %222 : vector<1x256xi1>, vector<1x256xf32>
    %224 = vector.extract_strided_slice %223 {offsets = [0, 0], sizes = [1, 128], strides = [1, 1]} : vector<1x256xf32> to vector<1x128xf32>
    %225 = vector.extract_strided_slice %223 {offsets = [0, 128], sizes = [1, 128], strides = [1, 1]} : vector<1x256xf32> to vector<1x128xf32>
    %226 = arith.addf %224, %225 : vector<1x128xf32>
    %c0_i32 = arith.constant 0 : i32
    %227 = arith.cmpi eq, %arg1, %c0_i32 : i32
    %228 = arith.extui %227 : i1 to i32
    %c0_i32_81 = arith.constant 0 : i32
    %229 = arith.cmpi ne, %228, %c0_i32_81 : i32
    scf.if %229 {
      %cst_90 = arith.constant 0.000000e+00 : f32
      %236 = vector.broadcast %cst_90 : f32 to vector<8x128xf32>
      %c0_91 = arith.constant 0 : index
      %c0_92 = arith.constant 0 : index
      %237 = vector.load %arg12[%c0_91, %c0_92] : memref<8x128xf32, #tpu.memory_space<vmem>>, vector<8x128xf32>
      tpu.vector_store %arg12[%c0_91, %c0_92], %236 {strides = array<i32>} : memref<8x128xf32, #tpu.memory_space<vmem>>, vector<8x128xf32>,
      %cst_93 = arith.constant 0.000000e+00 : f32
      %238 = vector.broadcast %cst_93 : f32 to vector<8x128xf32>
      %c0_94 = arith.constant 0 : index
      %c0_95 = arith.constant 0 : index
      %239 = vector.load %arg13[%c0_94, %c0_95] : memref<8x128xf32, #tpu.memory_space<vmem>>, vector<8x128xf32>
      tpu.vector_store %arg13[%c0_94, %c0_95], %238 {strides = array<i32>} : memref<8x128xf32, #tpu.memory_space<vmem>>, vector<8x128xf32>,
    } else {
    }
    %c0_82 = arith.constant 0 : index
    %c0_83 = arith.constant 0 : index
    %230 = vector.load %arg12[%c0_82, %c0_83] : memref<8x128xf32, #tpu.memory_space<vmem>>, vector<1x128xf32>
    %231 = arith.addf %230, %218 : vector<1x128xf32>
    %c0_84 = arith.constant 0 : index
    %c0_85 = arith.constant 0 : index
    %232 = vector.load %arg12[%c0_84, %c0_85] : memref<8x128xf32, #tpu.memory_space<vmem>>, vector<1x128xf32>
    tpu.vector_store %arg12[%c0_84, %c0_85], %231 {strides = array<i32>} : memref<8x128xf32, #tpu.memory_space<vmem>>, vector<1x128xf32>,
    %c0_86 = arith.constant 0 : index
    %c0_87 = arith.constant 0 : index
    %233 = vector.load %arg13[%c0_86, %c0_87] : memref<8x128xf32, #tpu.memory_space<vmem>>, vector<1x128xf32>
    %234 = arith.addf %233, %226 : vector<1x128xf32>
    %c0_88 = arith.constant 0 : index
    %c0_89 = arith.constant 0 : index
    %235 = vector.load %arg13[%c0_88, %c0_89] : memref<8x128xf32, #tpu.memory_space<vmem>>, vector<1x128xf32>
    tpu.vector_store %arg13[%c0_88, %c0_89], %234 {strides = array<i32>} : memref<8x128xf32, #tpu.memory_space<vmem>>, vector<1x128xf32>,
    return
  }
  func.func @transform_0(%arg0: i32, %arg1: i32) -> (i32, i32, i32) {
    %c0_i32 = arith.constant 0 : i32
    %c0_i32_0 = arith.constant 0 : i32
    %c0_i32_1 = arith.constant 0 : i32
    return %arg0, %c0_i32, %c0_i32_0 : i32, i32, i32
  }
  func.func @transform_1(%arg0: i32, %arg1: i32) -> (i32, i32, i32) {
    %c0_i32 = arith.constant 0 : i32
    %c0_i32_0 = arith.constant 0 : i32
    %c0_i32_1 = arith.constant 0 : i32
    return %arg0, %c0_i32, %c0_i32_0 : i32, i32, i32
  }
  func.func @transform_2(%arg0: i32, %arg1: i32) -> (i32, i32, i32) {
    %c0_i32 = arith.constant 0 : i32
    %c0_i32_0 = arith.constant 0 : i32
    return %arg0, %c0_i32, %arg1 : i32, i32, i32
  }
  func.func @transform_3(%arg0: i32, %arg1: i32) -> (i32, i32, i32) {
    %c0_i32 = arith.constant 0 : i32
    %c0_i32_0 = arith.constant 0 : i32
    return %arg0, %c0_i32, %arg1 : i32, i32, i32
  }
  func.func @transform_4(%arg0: i32, %arg1: i32) -> (i32, i32, i32) {
    %c0_i32 = arith.constant 0 : i32
    %c0_i32_0 = arith.constant 0 : i32
    return %arg0, %c0_i32, %arg1 : i32, i32, i32
  }
  func.func @transform_5(%arg0: i32, %arg1: i32) -> (i32, i32) {
    %c0_i32 = arith.constant 0 : i32
    %c0_i32_0 = arith.constant 0 : i32
    %c0_i32_1 = arith.constant 0 : i32
    return %c0_i32, %c0_i32_0 : i32, i32
  }
  func.func @transform_6(%arg0: i32, %arg1: i32) -> (i32, i32) {
    %c0_i32 = arith.constant 0 : i32
    %c0_i32_0 = arith.constant 0 : i32
    %c0_i32_1 = arith.constant 0 : i32
    return %c0_i32, %c0_i32_0 : i32, i32
  }
  func.func @transform_7(%arg0: i32, %arg1: i32) -> (i32, i32) {
    %c0_i32 = arith.constant 0 : i32
    %c0_i32_0 = arith.constant 0 : i32
    %c0_i32_1 = arith.constant 0 : i32
    return %c0_i32, %c0_i32_0 : i32, i32
  }
  func.func @transform_8(%arg0: i32, %arg1: i32) -> (i32, i32) {
    %c0_i32 = arith.constant 0 : i32
    %c0_i32_0 = arith.constant 0 : i32
    %c0_i32_1 = arith.constant 0 : i32
    return %c0_i32, %c0_i32_0 : i32, i32
  }
  func.func @transform_9(%arg0: i32, %arg1: i32) -> (i32, i32, i32) {
    %c0_i32 = arith.constant 0 : i32
    %c0_i32_0 = arith.constant 0 : i32
    return %arg0, %c0_i32, %arg1 : i32, i32, i32
  }
  func.func @transform_10(%arg0: i32, %arg1: i32) -> (i32, i32) {
    %c0_i32 = arith.constant 0 : i32
    %c0_i32_0 = arith.constant 0 : i32
    return %arg0, %c0_i32 : i32, i32
  }
  func.func @transform_11(%arg0: i32, %arg1: i32) -> (i32, i32) {
    %c0_i32 = arith.constant 0 : i32
    %c0_i32_0 = arith.constant 0 : i32
    return %arg0, %c0_i32 : i32, i32
  }
}

module attributes {stable_mosaic.version = 11 : i64} {
  func.func @_ic_kernel(%arg0: i32, %arg1: i32, %arg2: memref<1x64x16xbf16, #tpu.memory_space<vmem>>, %arg3: memref<1x2x256xf32, #tpu.memory_space<vmem>>, %arg4: memref<1x2x256xf32, #tpu.memory_space<vmem>>, %arg5: memref<8x128xf32, #tpu.memory_space<vmem>>) attributes {dimension_semantics = [#tpu.dimension_semantics<parallel>, #tpu.dimension_semantics<arbitrary>], iteration_bounds = array<i64: 2, 1>, scalar_prefetch = 0 : i64, scratch_operands = 0 : i64, tpu.core_type = #tpu.core_type<tc>, window_params = [{transform_indices = @transform_0, window_bounds = array<i64: 1, 64, 16>}, {transform_indices = @transform_1, window_bounds = array<i64: 1, 2, 256>}, {transform_indices = @transform_2, window_bounds = array<i64: 1, 2, 256>}, {transform_indices = @transform_3, window_bounds = array<i64: 8, 128>}]} {
    %0 = tpu.iota {dimensions = array<i32: 1>} : vector<1x256xi32>
    %c256_i32 = arith.constant 256 : i32
    %1 = arith.muli %arg1, %c256_i32 : i32
    %2 = vector.broadcast %1 : i32 to vector<1x256xi32>
    %3 = arith.addi %2, %0 : vector<1x256xi32>
    %c256_i32_0 = arith.constant 256 : i32
    %4 = vector.broadcast %c256_i32_0 : i32 to vector<1x256xi32>
    %5 = arith.cmpi slt, %3, %4 : vector<1x256xi32>
    %6 = tpu.iota {dimensions = array<i32: 0>} : vector<16x256xi32>
    %7 = arith.sitofp %6 : vector<16x256xi32> to vector<16x256xf32>
    %8 = tpu.iota {dimensions = array<i32: 0>} : vector<16x256xi32>
    %9 = arith.sitofp %8 : vector<16x256xi32> to vector<16x256xf32>
    %c0 = arith.constant 0 : index
    %c0_1 = arith.constant 0 : index
    %c0_2 = arith.constant 0 : index
    %10 = vector.load %arg3[%c0, %c0_1, %c0_2] : memref<1x2x256xf32, #tpu.memory_space<vmem>>, vector<1x1x256xf32>
    %11 = vector.shape_cast %10 : vector<1x1x256xf32> to vector<1x256xf32>
    %c0_3 = arith.constant 0 : index
    %c0_4 = arith.constant 0 : index
    %c0_5 = arith.constant 0 : index
    %12 = vector.load %arg4[%c0_3, %c0_4, %c0_5] : memref<1x2x256xf32, #tpu.memory_space<vmem>>, vector<1x1x256xf32>
    %13 = vector.shape_cast %12 : vector<1x1x256xf32> to vector<1x256xf32>
    %14 = arith.addf %11, %13 : vector<1x256xf32>
    %c0_6 = arith.constant 0 : index
    %c1 = arith.constant 1 : index
    %c0_7 = arith.constant 0 : index
    %15 = vector.load %arg3[%c0_6, %c1, %c0_7] : memref<1x2x256xf32, #tpu.memory_space<vmem>>, vector<1x1x256xf32>
    %16 = vector.shape_cast %15 : vector<1x1x256xf32> to vector<1x256xf32>
    %c0_8 = arith.constant 0 : index
    %c1_9 = arith.constant 1 : index
    %c0_10 = arith.constant 0 : index
    %17 = vector.load %arg4[%c0_8, %c1_9, %c0_10] : memref<1x2x256xf32, #tpu.memory_space<vmem>>, vector<1x1x256xf32>
    %18 = vector.shape_cast %17 : vector<1x1x256xf32> to vector<1x256xf32>
    %19 = arith.addf %16, %18 : vector<1x256xf32>
    %cst = arith.constant 1.600000e+01 : f32
    %20 = vector.broadcast %cst : f32 to vector<1x256xf32>
    %21 = arith.mulf %14, %20 : vector<1x256xf32>
    %cst_11 = arith.constant 0.000000e+00 : f32
    %cst_12 = arith.constant 1.500000e+01 : f32
    %22 = vector.broadcast %cst_11 : f32 to vector<1x256xf32>
    %23 = arith.maximumf %22, %21 : vector<1x256xf32>
    %24 = vector.broadcast %cst_12 : f32 to vector<1x256xf32>
    %25 = arith.minimumf %24, %23 : vector<1x256xf32>
    %cst_13 = arith.constant 1.600000e+01 : f32
    %26 = vector.broadcast %cst_13 : f32 to vector<1x256xf32>
    %27 = arith.mulf %19, %26 : vector<1x256xf32>
    %cst_14 = arith.constant 0.000000e+00 : f32
    %cst_15 = arith.constant 1.500000e+01 : f32
    %28 = vector.broadcast %cst_14 : f32 to vector<1x256xf32>
    %29 = arith.maximumf %28, %27 : vector<1x256xf32>
    %30 = vector.broadcast %cst_15 : f32 to vector<1x256xf32>
    %31 = arith.minimumf %30, %29 : vector<1x256xf32>
    %32 = vector.broadcast %25 : vector<1x256xf32> to vector<16x256xf32>
    %33 = arith.subf %7, %32 : vector<16x256xf32>
    %34 = math.absf %33 : vector<16x256xf32>
    %cst_16 = arith.constant 1.000000e+00 : f32
    %35 = vector.broadcast %cst_16 : f32 to vector<16x256xf32>
    %36 = arith.subf %35, %34 : vector<16x256xf32>
    %cst_17 = arith.constant 0.000000e+00 : f32
    %37 = vector.broadcast %cst_17 : f32 to vector<16x256xf32>
    %38 = arith.maximumf %37, %36 : vector<16x256xf32>
    %39 = vector.broadcast %31 : vector<1x256xf32> to vector<16x256xf32>
    %40 = arith.subf %9, %39 : vector<16x256xf32>
    %41 = math.absf %40 : vector<16x256xf32>
    %cst_18 = arith.constant 1.000000e+00 : f32
    %42 = vector.broadcast %cst_18 : f32 to vector<16x256xf32>
    %43 = arith.subf %42, %41 : vector<16x256xf32>
    %cst_19 = arith.constant 0.000000e+00 : f32
    %44 = vector.broadcast %cst_19 : f32 to vector<16x256xf32>
    %45 = arith.maximumf %44, %43 : vector<16x256xf32>
    %46 = arith.truncf %45 : vector<16x256xf32> to vector<16x256xbf16>
    %c0_20 = arith.constant 0 : index
    %c0_21 = arith.constant 0 : index
    %c0_22 = arith.constant 0 : index
    %47 = vector.load %arg2[%c0_20, %c0_21, %c0_22] : memref<1x64x16xbf16, #tpu.memory_space<vmem>>, vector<1x64x16xbf16>
    %48 = vector.shape_cast %47 : vector<1x64x16xbf16> to vector<64x16xbf16>
    %cst_23 = arith.constant dense<0.000000e+00> : vector<64x256xf32>
    %49 = tpu.matmul %48, %46, %cst_23 {dimension_numbers = #tpu.dot_dimension_numbers<[1], [0], [0], [1], [0, 0, 1, 1], [], []>} : vector<64x16xbf16>, vector<16x256xbf16>, vector<64x256xf32> -> vector<64x256xf32>
    %50 = vector.extract_strided_slice %49 {offsets = [0, 0], sizes = [16, 256], strides = [1, 1]} : vector<64x256xf32> to vector<16x256xf32>
    %51 = arith.mulf %38, %50 : vector<16x256xf32>
    %cst_24 = arith.constant dense<0.000000e+00> : vector<256xf32>
    %52 = vector.multi_reduction <add>, %51, %cst_24 [0] : vector<16x256xf32> to vector<256xf32>
    %53 = vector.shape_cast %52 : vector<256xf32> to vector<1x256xf32>
    %54 = vector.extract_strided_slice %49 {offsets = [16, 0], sizes = [16, 256], strides = [1, 1]} : vector<64x256xf32> to vector<16x256xf32>
    %55 = arith.mulf %38, %54 : vector<16x256xf32>
    %cst_25 = arith.constant dense<0.000000e+00> : vector<256xf32>
    %56 = vector.multi_reduction <add>, %55, %cst_25 [0] : vector<16x256xf32> to vector<256xf32>
    %57 = vector.shape_cast %56 : vector<256xf32> to vector<1x256xf32>
    %58 = vector.extract_strided_slice %49 {offsets = [32, 0], sizes = [16, 256], strides = [1, 1]} : vector<64x256xf32> to vector<16x256xf32>
    %59 = arith.mulf %38, %58 : vector<16x256xf32>
    %cst_26 = arith.constant dense<0.000000e+00> : vector<256xf32>
    %60 = vector.multi_reduction <add>, %59, %cst_26 [0] : vector<16x256xf32> to vector<256xf32>
    %61 = vector.shape_cast %60 : vector<256xf32> to vector<1x256xf32>
    %62 = vector.extract_strided_slice %49 {offsets = [48, 0], sizes = [16, 256], strides = [1, 1]} : vector<64x256xf32> to vector<16x256xf32>
    %63 = arith.mulf %38, %62 : vector<16x256xf32>
    %cst_27 = arith.constant dense<0.000000e+00> : vector<256xf32>
    %64 = vector.multi_reduction <add>, %63, %cst_27 [0] : vector<16x256xf32> to vector<256xf32>
    %65 = vector.shape_cast %64 : vector<256xf32> to vector<1x256xf32>
    %66 = arith.addf %14, %61 : vector<1x256xf32>
    %67 = arith.addf %19, %65 : vector<1x256xf32>
    %cst_28 = arith.constant 1.600000e+01 : f32
    %68 = vector.broadcast %cst_28 : f32 to vector<1x256xf32>
    %69 = arith.mulf %66, %68 : vector<1x256xf32>
    %cst_29 = arith.constant 0.000000e+00 : f32
    %cst_30 = arith.constant 1.500000e+01 : f32
    %70 = vector.broadcast %cst_29 : f32 to vector<1x256xf32>
    %71 = arith.maximumf %70, %69 : vector<1x256xf32>
    %72 = vector.broadcast %cst_30 : f32 to vector<1x256xf32>
    %73 = arith.minimumf %72, %71 : vector<1x256xf32>
    %cst_31 = arith.constant 1.600000e+01 : f32
    %74 = vector.broadcast %cst_31 : f32 to vector<1x256xf32>
    %75 = arith.mulf %67, %74 : vector<1x256xf32>
    %cst_32 = arith.constant 0.000000e+00 : f32
    %cst_33 = arith.constant 1.500000e+01 : f32
    %76 = vector.broadcast %cst_32 : f32 to vector<1x256xf32>
    %77 = arith.maximumf %76, %75 : vector<1x256xf32>
    %78 = vector.broadcast %cst_33 : f32 to vector<1x256xf32>
    %79 = arith.minimumf %78, %77 : vector<1x256xf32>
    %80 = vector.broadcast %73 : vector<1x256xf32> to vector<16x256xf32>
    %81 = arith.subf %7, %80 : vector<16x256xf32>
    %82 = math.absf %81 : vector<16x256xf32>
    %cst_34 = arith.constant 1.000000e+00 : f32
    %83 = vector.broadcast %cst_34 : f32 to vector<16x256xf32>
    %84 = arith.subf %83, %82 : vector<16x256xf32>
    %cst_35 = arith.constant 0.000000e+00 : f32
    %85 = vector.broadcast %cst_35 : f32 to vector<16x256xf32>
    %86 = arith.maximumf %85, %84 : vector<16x256xf32>
    %87 = vector.broadcast %79 : vector<1x256xf32> to vector<16x256xf32>
    %88 = arith.subf %9, %87 : vector<16x256xf32>
    %89 = math.absf %88 : vector<16x256xf32>
    %cst_36 = arith.constant 1.000000e+00 : f32
    %90 = vector.broadcast %cst_36 : f32 to vector<16x256xf32>
    %91 = arith.subf %90, %89 : vector<16x256xf32>
    %cst_37 = arith.constant 0.000000e+00 : f32
    %92 = vector.broadcast %cst_37 : f32 to vector<16x256xf32>
    %93 = arith.maximumf %92, %91 : vector<16x256xf32>
    %94 = arith.truncf %93 : vector<16x256xf32> to vector<16x256xbf16>
    %c0_38 = arith.constant 0 : index
    %c0_39 = arith.constant 0 : index
    %c0_40 = arith.constant 0 : index
    %95 = vector.load %arg2[%c0_38, %c0_39, %c0_40] : memref<1x64x16xbf16, #tpu.memory_space<vmem>>, vector<1x32x16xbf16>
    %96 = vector.shape_cast %95 : vector<1x32x16xbf16> to vector<32x16xbf16>
    %cst_41 = arith.constant dense<0.000000e+00> : vector<32x256xf32>
    %97 = tpu.matmul %96, %94, %cst_41 {dimension_numbers = #tpu.dot_dimension_numbers<[1], [0], [0], [1], [0, 0, 1, 1], [], []>} : vector<32x16xbf16>, vector<16x256xbf16>, vector<32x256xf32> -> vector<32x256xf32>
    %98 = vector.extract_strided_slice %97 {offsets = [0, 0], sizes = [16, 256], strides = [1, 1]} : vector<32x256xf32> to vector<16x256xf32>
    %99 = arith.mulf %86, %98 : vector<16x256xf32>
    %cst_42 = arith.constant dense<0.000000e+00> : vector<256xf32>
    %100 = vector.multi_reduction <add>, %99, %cst_42 [0] : vector<16x256xf32> to vector<256xf32>
    %101 = vector.shape_cast %100 : vector<256xf32> to vector<1x256xf32>
    %102 = vector.extract_strided_slice %97 {offsets = [16, 0], sizes = [16, 256], strides = [1, 1]} : vector<32x256xf32> to vector<16x256xf32>
    %103 = arith.mulf %86, %102 : vector<16x256xf32>
    %cst_43 = arith.constant dense<0.000000e+00> : vector<256xf32>
    %104 = vector.multi_reduction <add>, %103, %cst_43 [0] : vector<16x256xf32> to vector<256xf32>
    %105 = vector.shape_cast %104 : vector<256xf32> to vector<1x256xf32>
    %106 = arith.addf %61, %101 : vector<1x256xf32>
    %107 = arith.addf %65, %105 : vector<1x256xf32>
    %108 = arith.mulf %106, %106 : vector<1x256xf32>
    %109 = arith.mulf %107, %107 : vector<1x256xf32>
    %110 = arith.addf %108, %109 : vector<1x256xf32>
    %111 = arith.addf %14, %53 : vector<1x256xf32>
    %112 = arith.addf %19, %57 : vector<1x256xf32>
    %cst_44 = arith.constant 1.600000e+01 : f32
    %113 = vector.broadcast %cst_44 : f32 to vector<1x256xf32>
    %114 = arith.mulf %111, %113 : vector<1x256xf32>
    %cst_45 = arith.constant 0.000000e+00 : f32
    %cst_46 = arith.constant 1.500000e+01 : f32
    %115 = vector.broadcast %cst_45 : f32 to vector<1x256xf32>
    %116 = arith.maximumf %115, %114 : vector<1x256xf32>
    %117 = vector.broadcast %cst_46 : f32 to vector<1x256xf32>
    %118 = arith.minimumf %117, %116 : vector<1x256xf32>
    %cst_47 = arith.constant 1.600000e+01 : f32
    %119 = vector.broadcast %cst_47 : f32 to vector<1x256xf32>
    %120 = arith.mulf %112, %119 : vector<1x256xf32>
    %cst_48 = arith.constant 0.000000e+00 : f32
    %cst_49 = arith.constant 1.500000e+01 : f32
    %121 = vector.broadcast %cst_48 : f32 to vector<1x256xf32>
    %122 = arith.maximumf %121, %120 : vector<1x256xf32>
    %123 = vector.broadcast %cst_49 : f32 to vector<1x256xf32>
    %124 = arith.minimumf %123, %122 : vector<1x256xf32>
    %125 = vector.broadcast %118 : vector<1x256xf32> to vector<16x256xf32>
    %126 = arith.subf %7, %125 : vector<16x256xf32>
    %127 = math.absf %126 : vector<16x256xf32>
    %cst_50 = arith.constant 1.000000e+00 : f32
    %128 = vector.broadcast %cst_50 : f32 to vector<16x256xf32>
    %129 = arith.subf %128, %127 : vector<16x256xf32>
    %cst_51 = arith.constant 0.000000e+00 : f32
    %130 = vector.broadcast %cst_51 : f32 to vector<16x256xf32>
    %131 = arith.maximumf %130, %129 : vector<16x256xf32>
    %132 = vector.broadcast %124 : vector<1x256xf32> to vector<16x256xf32>
    %133 = arith.subf %9, %132 : vector<16x256xf32>
    %134 = math.absf %133 : vector<16x256xf32>
    %cst_52 = arith.constant 1.000000e+00 : f32
    %135 = vector.broadcast %cst_52 : f32 to vector<16x256xf32>
    %136 = arith.subf %135, %134 : vector<16x256xf32>
    %cst_53 = arith.constant 0.000000e+00 : f32
    %137 = vector.broadcast %cst_53 : f32 to vector<16x256xf32>
    %138 = arith.maximumf %137, %136 : vector<16x256xf32>
    %139 = arith.truncf %138 : vector<16x256xf32> to vector<16x256xbf16>
    %c0_54 = arith.constant 0 : index
    %c32 = arith.constant 32 : index
    %c0_55 = arith.constant 0 : index
    %140 = vector.load %arg2[%c0_54, %c32, %c0_55] : memref<1x64x16xbf16, #tpu.memory_space<vmem>>, vector<1x32x16xbf16>
    %141 = vector.shape_cast %140 : vector<1x32x16xbf16> to vector<32x16xbf16>
    %cst_56 = arith.constant dense<0.000000e+00> : vector<32x256xf32>
    %142 = tpu.matmul %141, %139, %cst_56 {dimension_numbers = #tpu.dot_dimension_numbers<[1], [0], [0], [1], [0, 0, 1, 1], [], []>} : vector<32x16xbf16>, vector<16x256xbf16>, vector<32x256xf32> -> vector<32x256xf32>
    %143 = vector.extract_strided_slice %142 {offsets = [0, 0], sizes = [16, 256], strides = [1, 1]} : vector<32x256xf32> to vector<16x256xf32>
    %144 = arith.mulf %131, %143 : vector<16x256xf32>
    %cst_57 = arith.constant dense<0.000000e+00> : vector<256xf32>
    %145 = vector.multi_reduction <add>, %144, %cst_57 [0] : vector<16x256xf32> to vector<256xf32>
    %146 = vector.shape_cast %145 : vector<256xf32> to vector<1x256xf32>
    %147 = vector.extract_strided_slice %142 {offsets = [16, 0], sizes = [16, 256], strides = [1, 1]} : vector<32x256xf32> to vector<16x256xf32>
    %148 = arith.mulf %131, %147 : vector<16x256xf32>
    %cst_58 = arith.constant dense<0.000000e+00> : vector<256xf32>
    %149 = vector.multi_reduction <add>, %148, %cst_58 [0] : vector<16x256xf32> to vector<256xf32>
    %150 = vector.shape_cast %149 : vector<256xf32> to vector<1x256xf32>
    %151 = arith.addf %53, %146 : vector<1x256xf32>
    %152 = arith.addf %57, %150 : vector<1x256xf32>
    %153 = arith.mulf %151, %151 : vector<1x256xf32>
    %154 = arith.addf %110, %153 : vector<1x256xf32>
    %155 = arith.mulf %152, %152 : vector<1x256xf32>
    %156 = arith.addf %154, %155 : vector<1x256xf32>
    %cst_59 = arith.constant 0.000000e+00 : f32
    %157 = vector.broadcast %cst_59 : f32 to vector<1x256xf32>
    %158 = arith.select %5, %156, %157 : vector<1x256xi1>, vector<1x256xf32>
    %159 = vector.extract_strided_slice %158 {offsets = [0, 0], sizes = [1, 128], strides = [1, 1]} : vector<1x256xf32> to vector<1x128xf32>
    %160 = vector.extract_strided_slice %158 {offsets = [0, 128], sizes = [1, 128], strides = [1, 1]} : vector<1x256xf32> to vector<1x128xf32>
    %161 = arith.addf %159, %160 : vector<1x128xf32>
    %c0_i32 = arith.constant 0 : i32
    %162 = arith.cmpi eq, %arg1, %c0_i32 : i32
    %163 = arith.extui %162 : i1 to i32
    %c0_i32_60 = arith.constant 0 : i32
    %164 = arith.cmpi ne, %163, %c0_i32_60 : i32
    scf.if %164 {
      %cst_65 = arith.constant 0.000000e+00 : f32
      %168 = vector.broadcast %cst_65 : f32 to vector<8x128xf32>
      %c0_66 = arith.constant 0 : index
      %c0_67 = arith.constant 0 : index
      %169 = vector.load %arg5[%c0_66, %c0_67] : memref<8x128xf32, #tpu.memory_space<vmem>>, vector<8x128xf32>
      tpu.vector_store %arg5[%c0_66, %c0_67], %168 {strides = array<i32>} : memref<8x128xf32, #tpu.memory_space<vmem>>, vector<8x128xf32>,
    } else {
    }
    %c0_61 = arith.constant 0 : index
    %c0_62 = arith.constant 0 : index
    %165 = vector.load %arg5[%c0_61, %c0_62] : memref<8x128xf32, #tpu.memory_space<vmem>>, vector<1x128xf32>
    %166 = arith.addf %165, %161 : vector<1x128xf32>
    %c0_63 = arith.constant 0 : index
    %c0_64 = arith.constant 0 : index
    %167 = vector.load %arg5[%c0_63, %c0_64] : memref<8x128xf32, #tpu.memory_space<vmem>>, vector<1x128xf32>
    tpu.vector_store %arg5[%c0_63, %c0_64], %166 {strides = array<i32>} : memref<8x128xf32, #tpu.memory_space<vmem>>, vector<1x128xf32>,
    return
  }
  func.func @transform_0(%arg0: i32, %arg1: i32) -> (i32, i32, i32) {
    %c0_i32 = arith.constant 0 : i32
    %c0_i32_0 = arith.constant 0 : i32
    %c0_i32_1 = arith.constant 0 : i32
    return %arg0, %c0_i32, %c0_i32_0 : i32, i32, i32
  }
  func.func @transform_1(%arg0: i32, %arg1: i32) -> (i32, i32, i32) {
    %c0_i32 = arith.constant 0 : i32
    %c0_i32_0 = arith.constant 0 : i32
    return %arg0, %c0_i32, %arg1 : i32, i32, i32
  }
  func.func @transform_2(%arg0: i32, %arg1: i32) -> (i32, i32, i32) {
    %c0_i32 = arith.constant 0 : i32
    %c0_i32_0 = arith.constant 0 : i32
    return %arg0, %c0_i32, %arg1 : i32, i32, i32
  }
  func.func @transform_3(%arg0: i32, %arg1: i32) -> (i32, i32) {
    %c0_i32 = arith.constant 0 : i32
    %c0_i32_0 = arith.constant 0 : i32
    return %arg0, %c0_i32 : i32, i32
  }
}

</mosaic_0001>

<bundles_post_ra>
// kernel: inverse_consistent_forward.2
= control target key start
LH: loop header
LB: loop body
LE: loop exit
PB: predicated region body
PF: predicated region fallthrough
CT: control target
= control target key end

     0   :  { %s1577_s17 = smov 0   ;;  %s1579_s18 = smov 0   ;;  %s1778_s0 = inlined_call_operand.vmem [shape: bf16[2,16,16], index: 0, kind: input, shape index: {}]   ;;  %s1779_s1 = inlined_call_operand.vmem [shape: bf16[2,16,16], index: 1, kind: input, shape index: {}]   ;;  %s1780_s2 = inlined_call_operand.vmem [shape: f32[2,1,256], index: 2, kind: input, shape index: {}]   ;;  %s1781_s3 = inlined_call_operand.vmem [shape: f32[2,1,256], index: 3, kind: input, shape index: {}]   ;;  %s1782_s4 = inlined_call_operand.vmem [shape: f32[2,2,256], index: 4, kind: input, shape index: {}]   ;;  %s1783_s5 = inlined_call_operand.vmem [shape: f32[8,2], index: 5, kind: input, shape index: {}]   ;;  %s1784_s6 = inlined_call_operand.vmem [shape: f32[8,1], index: 6, kind: input, shape index: {}]   ;;  %s1785_s7 = inlined_call_operand.vmem [shape: f32[8,2], index: 7, kind: input, shape index: {}]   ;;  %s1786_s8 = inlined_call_operand.vmem [shape: f32[2,1], index: 8, kind: input, shape index: {}]   ;;  %s1787_s9 = inlined_call_operand.vmem [shape: bf16[2,4,256], index: 9, kind: output, shape index: {0}]   ;;  %s1788_s10 = inlined_call_operand.vmem [shape: f32[16,128], index: 10, kind: output, shape index: {1}]   ;;  %s1789_s11 = inlined_call_operand.vmem [shape: f32[16,128], index: 11, kind: output, shape index: {2}]  }
   0x1   :  { %s1581_s19 = smov 0  }
   0x2 LB: > { %s34_s20 = sadd.s32 1, %s1507_s18  ;;  %p1414_p0 = scmp.ge.s32.totalorder %s1511_s19, 1  ;;  %s1511_s19 = sphi %s1581_s19, %s22_s19   ;;  %s1507_s18 = sphi %s1579_s18, %s1791_s18   ;;  %s1503_s17 = sphi %s1577_s17, %s1790_s17  }
   0x3   : > { %p36_p1 = scmp.ge.s32.totalorder %s34_s20, 2  ;;  %p415_p2 = scmp.lt.s32.totalorder %s1511_s19, 3 }
   0x5   : > { %s1793_s20 = smov (%p36_p1, %s34_s20), 0  ;;  %p416_p3 = pnand %p1414_p0, %p415_p2 }
   0x6   : > { %p497_p4 = scmp.lt.s32.totalorder (!%p416_p3), %s1503_s17, 1 }
   0x7   : > { %419 = sbr.rel (%p416_p3) target bundleno = 453 (0x1c5), region = 56 }
   0xc   : > { %v568_v0 = vld [vmem:[%s1783_s5] sm:$0xff]  ;;  %v1513_v2 = vmov 0   ;;  %v1514_v4 = vmov 1   ;;  %s1795_s17 = smov (!%p497_p4, %s1503_s17), 1  ;;  %v1515_v6 = vmov 0.0   ;;  %v578_v7 = vlaneseq }
   0xd   : > { %v569_v1 = vld [vmem:[%s1784_s6] sm:$0xff]  ;;  %1472 = vset.pattern.permute.xlu0 %v1513_v2  ;;  %1474 = vset.pattern.permute.xlu1 %v1513_v2  ;;  %s1614_s29 = sshll.u32 %s1795_s17, 3  ;;  %s1419_s27 = sshll.u32 %s1795_s17, 1  ;;  %v1516_v36 = vmov 1966171168   ;;  %vm726_vm0 = vcmask 1040384  }
   0xe   : > { %574 = vperm.xlu0 %1472, %v568_v0   ;;  %611 = vperm.xlu1 %1474, %v569_v1   ;;  %v570_v3 = vld [vmem:[%s1785_s7] sm:$0xff]  ;;  %s1620_s13 = scalar_lea.vmem %s1789_s11, %s1614_s29  ;;  %s501_s16 = scalar_lea.vmem %s1778_s0, %s1614_s29  ;;  %v1639_v8 = vshrl.u32 %v578_v7, 7  ;;  %v760_v37 = vunpack.c.l.s4 %v1516_v36  ;;  %vm729_vm1 = vcmask 1041408   ;;  %vm732_vm2 = vcmask 1042432  }
   0xf   : > { %898 = vmatprep.mubr.bf16.mxu0 %v1513_v2  ;;  %1101 = vmatprep.mubr.bf16.mxu1 %v1513_v2  ;;  %v571_v5 = vld [vmem:[%s1786_s8] sm:$0x3]  ;;  %1200 = vst [vmem:[%s1620_s13] sm:$0xff] %v1515_v6  ;;  %s1631_s23 = scalar_lea.vmem %s1788_s10, %s1614_s29  ;;  %s506_s26 = scalar_lea.vmem %s1779_s1, %s1614_s29  ;;  %vm862_vm3 = vcmask 130048  }
  0x10   : > { %1199 = vst [vmem:[%s1631_s23] sm:$0xff] %v1515_v6  ;;  %s514_s12 = scalar_lea.vmem %s1780_s2, %s1419_s27  ;;  %s523_s21 = scalar_lea.vmem %s1781_s3, %s1419_s27  ;;  %v1648_v9 = vsub.s32 0, %v1639_v8  ;;  %v1651_v10 = vsub.s32 1, %v1639_v8  ;;  %v761_v38 = vunpack.c.0.s8 %v760_v37 }
  0x11   : > { %v563_v11 = vld [vmem:[%s514_s12] sm:$0x3]  ;;  %s1442_s22 = sshll.u32 %s1795_s17, 2 }
  0x12   : > { %1473 = vset.pattern.permute.xlu0 %v1514_v4  ;;  %1475 = vset.pattern.permute.xlu1 %v1514_v4  ;;  %v564_v12 = vld [vmem:[%s523_s21] sm:$0x3]  ;;  %v1654_v14 = vrot.slane %v563_v11, %v1648_v9  ;;  %v1657_v15 = vrot.slane %v563_v11, %v1651_v10  ;;  %v1674_v46 = vsub.s32 %v761_v38, %v1639_v8  ;;  %s533_s27 = scalar_lea.vmem %s1782_s4, %s1442_s22  ;;  %s543_s30 = scalar_lea.vmem %s1787_s9, %s1442_s22 }
  0x13   : > { %591 = vperm.xlu0 %1473, %v568_v0   ;;  %645 = vperm.xlu1 %1475, %v570_v3   ;;  %v1660_v16 = vrot.slane %v564_v12, %v1648_v9  ;;  %v1663_v17 = vrot.slane %v564_v12, %v1651_v10 }
  0x17   : > { %1477 = vset.pattern.permute.xlu0 %v1513_v2  ;;  %1476 = vset.pattern.permute.xlu1 %v1513_v2 }
  0x18   : > { %620 = vperm.xlu0 %1477, %v570_v3   ;;  %639 = vperm.xlu1 %1476, %v571_v5  }
  0x1c   : > { %1478 = vset.pattern.permute.xlu0 %v1514_v4 }
  0x89   : > { %v575_v13 = vpop.permute.xlu0 %574  ;;  %v612_v27 = vpop.permute.xlu1 %611 }
  0x8a   : > { %v588_v18 = vmul.f32 %v1654_v14, %v575_v13  ;;  %v589_v19 = vmul.f32 %v1657_v15, %v575_v13  ;;  %v668_v20 = vmul.f32 %v1660_v16, %v575_v13  ;;  %v669_v21 = vmul.f32 %v1663_v17, %v575_v13 }
  0x8e   : > { %v592_v22 = vpop.permute.xlu0 %591  ;;  %v646_v39 = vpop.permute.xlu1 %645 }
  0x8f   : > { %v605_v23 = vmul.f32 %v1660_v16, %v592_v22  ;;  %v606_v24 = vmul.f32 %v1663_v17, %v592_v22  ;;  %v670_v25 = vmul.f32 %v592_v22, %v1654_v14  ;;  %v671_v26 = vmul.f32 %v592_v22, %v1657_v15 }
  0x91   : > { %v607_v28 = vadd.f32 %v605_v23, %v588_v18  ;;  %v608_v29 = vadd.f32 %v606_v24, %v589_v19  ;;  %v672_v30 = vadd.f32 %v670_v25, %v668_v20  ;;  %v673_v31 = vadd.f32 %v671_v26, %v669_v21 }
  0x93   : > { %v614_v32 = vadd.f32 %v612_v27, %v607_v28  ;;  %v615_v33 = vadd.f32 %v612_v27, %v608_v29  ;;  %v674_v34 = vadd.f32 %v672_v30, %v612_v27  ;;  %v675_v35 = vadd.f32 %v673_v31, %v612_v27  ;;  %v621_v40 = vpop.permute.xlu0 %620 }
  0x95   : > { %1481 = vtanh.f32 %v614_v32 }
  0x96   : > { %1483 = vtanh.f32 %v615_v33  ;;  %v640_v33 = vpop.permute.xlu1 %639 }
  0x97   : > { %1485 = vtanh.f32 %v674_v34 }
  0x98   : > { %1487 = vtanh.f32 %v675_v35 }
  0xa2   : > { %v1482_v41 = vpop.eup %1481 }
  0xa3   : > { %v1484_v42 = vpop.eup %1483  ;;  %v648_v43 = vmul.f32 %v1482_v41, %v646_v39  ;;  %v623_v44 = vmul.f32 %v1482_v41, %v621_v40 }
  0xa4   : > { %v1486_v45 = vpop.eup %1485  ;;  %v649_v47 = vmul.f32 %v1484_v42, %v646_v39  ;;  %v624_v48 = vmul.f32 %v1484_v42, %v621_v40 }
  0xa5   : > { %v1488_v49 = vpop.eup %1487  ;;  %v650_v50 = vrot.slane %v648_v43, 4  ;;  %v694_v51 = vmul.f32 %v1486_v45, %v646_v39  ;;  %v625_v52 = vrot.slane %v623_v44, 4  ;;  %v678_v53 = vmul.f32 %v1486_v45, %v621_v40 }
  0xa6   : > { %v656_v54 = vrot.slane %v649_v47, 4  ;;  %v695_v55 = vmul.f32 %v1488_v49, %v646_v39  ;;  %v631_v56 = vrot.slane %v624_v48, 4  ;;  %v679_v57 = vmul.f32 %v1488_v49, %v621_v40 }
  0xa7   : > { %v651_v58 = vadd.f32 %v650_v50, %v648_v43  ;;  %v696_v59 = vrot.slane %v694_v51, 4  ;;  %v626_v60 = vadd.f32 %v625_v52, %v623_v44  ;;  %v680_v61 = vrot.slane %v678_v53, 4 }
  0xa8   : > { %v657_v62 = vadd.f32 %v656_v54, %v649_v47  ;;  %v702_v63 = vrot.slane %v695_v55, 4  ;;  %v632_v0 = vadd.f32 %v631_v56, %v624_v48  ;;  %v686_v1 = vrot.slane %v679_v57, 4 }
  0xa9   : > { %v652_v2 = vrot.slane %v651_v58, 2  ;;  %v697_v3 = vadd.f32 %v696_v59, %v694_v51  ;;  %v627_v4 = vrot.slane %v626_v60, 2  ;;  %v681_v5 = vadd.f32 %v680_v61, %v678_v53 }
  0xaa   : > { %v658_v6 = vrot.slane %v657_v62, 2  ;;  %v703_v7 = vadd.f32 %v702_v63, %v695_v55  ;;  %v633_v11 = vrot.slane %v632_v0, 2  ;;  %v687_v12 = vadd.f32 %v686_v1, %v679_v57 }
  0xab   : > { %v653_v13 = vadd.f32 %v652_v2, %v651_v58  ;;  %v698_v18 = vrot.slane %v697_v3, 2  ;;  %v628_v19 = vadd.f32 %v627_v4, %v626_v60  ;;  %v682_v20 = vrot.slane %v681_v5, 2 }
  0xac   : > { %v659_v21 = vadd.f32 %v658_v6, %v657_v62  ;;  %v704_v22 = vrot.slane %v703_v7, 2  ;;  %v634_v23 = vadd.f32 %v633_v11, %v632_v0  ;;  %v688_v24 = vrot.slane %v687_v12, 2 }
  0xad   : > { %v654_v25 = vrot.slane %v653_v13, 1  ;;  %v699_v26 = vadd.f32 %v698_v18, %v697_v3  ;;  %v629_v27 = vrot.slane %v628_v19, 1  ;;  %v683_v28 = vadd.f32 %v682_v20, %v681_v5 }
  0xae   : > { %v660_v29 = vrot.slane %v659_v21, 1  ;;  %v705_v30 = vadd.f32 %v704_v22, %v703_v7  ;;  %v635_v31 = vrot.slane %v634_v23, 1  ;;  %v689_v32 = vadd.f32 %v688_v24, %v687_v12 }
  0xaf   : > { %v655_v34 = vadd.f32 %v654_v25, %v653_v13  ;;  %v700_v35 = vrot.slane %v699_v26, 1  ;;  %v630_v36 = vadd.f32 %v629_v27, %v628_v19  ;;  %v684_v37 = vrot.slane %v683_v28, 1 }
  0xb0   : > { %v661_v38 = vadd.f32 %v660_v29, %v659_v21  ;;  %v706_v39 = vrot.slane %v705_v30, 1  ;;  %v636_v40 = vadd.f32 %v635_v31, %v634_v23  ;;  %v690_v41 = vrot.slane %v689_v32, 1  ;;  %v1427_v31 = vld [vmem:[%s533_s27 + $0x1] ss:$2 sm:$0x3] }
  0xb1   : > { %v701_v42 = vadd.f32 %v700_v35, %v699_v26  ;;  %v685_v43 = vadd.f32 %v684_v37, %v683_v28  ;;  %v642_v44 = vadd.f32 %v640_v33, %v630_v36  ;;  %v662_v45 = vadd.f32 %v655_v34, %v640_v33 }
  0xb2   : > { %v707_v47 = vadd.f32 %v706_v39, %v705_v30  ;;  %v691_v48 = vadd.f32 %v690_v41, %v689_v32  ;;  %v643_v49 = vadd.f32 %v640_v33, %v636_v40  ;;  %v663_v50 = vadd.f32 %v661_v38, %v640_v33  ;;  %v565_v30 = vld [vmem:[%s533_s27] ss:$2 sm:$0x3] }
  0xb3   : > { %v664_v51 = vmul.f32 0.05, %v642_v44  ;;  %v666_v52 = vmul.f32 0.05, %v662_v45  ;;  %v692_v53 = vadd.f32 %v685_v43, %v640_v33  ;;  %v708_v54 = vadd.f32 %v701_v42, %v640_v33  ;;  %v1204_v40 = vld [vmem:[%s1620_s13] sm:$0x1] }
  0xb4   : > { %v665_v55 = vmul.f32 0.05, %v643_v49  ;;  %v667_v56 = vmul.f32 0.05, %v663_v50  ;;  %v693_v57 = vadd.f32 %v691_v48, %v640_v33  ;;  %v709_v58 = vadd.f32 %v707_v47, %v640_v33 }
  0xb5   : > { %v710_v59 = vmul.f32 0.05, %v692_v53  ;;  %v712_v60 = vmul.f32 0.05, %v708_v54  ;;  %v727_v61 = vsel %vm726_vm0, %v664_v51, %v666_v52  ;;  %v1180_v62 = vmul.f32 %v664_v51, %v664_v51 }
  0xb6   : > { %v711_v63 = vmul.f32 0.05, %v693_v57  ;;  %v713_v0 = vmul.f32 0.05, %v709_v58  ;;  %v728_v1 = vsel %vm726_vm0, %v665_v55, %v667_v56  ;;  %v758_v2 = vcombine.low %v664_v51, %v665_v55 }
  0xb7   : > { %v716_v3 = vrot.slane %v710_v59, 6  ;;  %v722_v4 = vrot.slane %v712_v60, 6  ;;  %v780_v5 = vcombine.low %v666_v52, %v667_v56  ;;  %v1181_v6 = vmul.f32 %v665_v55, %v665_v55 }
  0xb8   : > { %v717_v7 = vrot.slane %v711_v63, 6  ;;  %v723_v11 = vrot.slane %v713_v0, 6  ;;  %v964_v12 = vcombine.low %v710_v59, %v711_v63  ;;  %v984_v13 = vcombine.low %v712_v60, %v713_v0 }
  0xb9   : > { %v730_v18 = vsel %vm729_vm1, %v727_v61, %v716_v3  ;;  %v1182_v19 = vmul.f32 %v666_v52, %v666_v52  ;;  %v1183_v20 = vmul.f32 %v667_v56, %v667_v56  ;;  %v787_v21 = vrot.slane %v780_v5, %v1674_v46 }
  0xba   : > { %v731_v22 = vsel %vm729_vm1, %v728_v1, %v717_v7  ;;  %v733_v23 = vsel %vm732_vm2, %v730_v18, %v722_v4  ;;  %v991_v24 = vrot.slane %v984_v13, %v1674_v46  ;;  %v765_v25 = vrot.slane %v758_v2, %v1674_v46 }
  0xbb   : > { %v734_v26 = vsel %vm732_vm2, %v731_v22, %v723_v11  ;;  %v1186_v27 = vrot.slane %v1182_v19, 1  ;;  %v1187_v28 = vrot.slane %v1183_v20, 1  ;;  %v788_v29 = vcombine.high %v787_v21, %v787_v21 }
  0xbc   : > { %v1428_v32 = vpack.c.bf16 %v734_v26, %v733_v23  ;;  %v992_v33 = vcombine.high %v991_v24, %v991_v24  ;;  %v772_v34 = vrot.slane %v765_v25, %v1674_v46  ;;  %v971_v35 = vrot.slane %v964_v12, %v1674_v46 }
  0xbd   : > { %v1190_v36 = vadd.f32 %v1186_v27, %v1180_v62  ;;  %v1191_v37 = vadd.f32 %v1187_v28, %v1181_v6  ;;  %v795_v38 = vrot.slane %v788_v29, %v1674_v46  ;;  %v751_v53 = vadd.s32 8, %v1639_v8 }
  0xbe   : > { %1429 = vst.sshfl [vmem:[%s543_s30] sm:$0x33 pattern:$0x76325410] %v1428_v32  ;;  %v999_v39 = vrot.slane %v992_v33, %v1674_v46  ;;  %v774_v41 = vadd.f32 %v772_v34, %v565_v30  ;;  %v978_v42 = vrot.slane %v971_v35, %v1674_v46  ;;  %v1703_v60 = vcvt.s32.f32 %v1639_v8 }
  0xbf   : > { %v797_v43 = vadd.f32 %v1427_v31, %v795_v38  ;;  %v1194_v44 = vadd.f32 %v1191_v37, %v1190_v36  ;;  %v1705_v61 = vcvt.s32.f32 %v751_v53 }
  0xc0   : > { %v1001_v45 = vadd.f32 %v1427_v31, %v999_v39  ;;  %v775_v47 = vmul.f32 16.0, %v774_v41  ;;  %v980_v48 = vadd.f32 %v978_v42, %v565_v30 }
  0xc1   : > { %v798_v49 = vmul.f32 16.0, %v797_v43  ;;  %v1205_v50 = vadd.f32 %v1204_v40, %v1194_v44 }
  0xc2   : > { %v1002_v51 = vmul.f32 16.0, %v1001_v45  ;;  %v776_v52 = vmax.f32 %v775_v47, 0.0  ;;  %v981_v57 = vmul.f32 16.0, %v980_v48 }
  0xc3   : > { %v799_v54 = vmax.f32 %v798_v49, 0.0  ;;  %1206 = vst [vmem:[%s1620_s13] sm:$0x1] %v1205_v50 }
  0xc4   : > { %v1003_v55 = vmax.f32 %v1002_v51, 0.0  ;;  %v777_v59 = vmin.f32 %v776_v52, 15.0  ;;  %v982_v4 = vmax.f32 %v981_v57, 0.0 }
  0xc5   : > { %v800_v56 = vmin.f32 %v799_v54, 15.0 }
  0xc6   : > { %v1700_v58 = vmin.f32 %v1003_v55, 15.0  ;;  %v1718_v6 = vrot.slane %v777_v59, %v1648_v9  ;;  %v927_v7 = vsub.f32 1.0, %v777_v59  ;;  %v983_v50 = vmin.f32 %v982_v4, 15.0 }
  0xc7   : > { %v836_v62 = vrot.slane %v800_v56, %v1651_v10  ;;  %v832_v63 = vrot.slane %v800_v56, %v1648_v9  ;;  %v933_v13 = vsub.f32 1.0, %v800_v56  ;;  %v1432_v53 = vadd.f32 -14.0, %v777_v59 }
  0xc8   : > { %v1040_v0 = vrot.slane %v1700_v58, %v1651_v10  ;;  %v1036_v3 = vrot.slane %v1700_v58, %v1648_v9  ;;  %v1136_v21 = vsub.f32 1.0, %v1700_v58  ;;  %v812_v42 = vsub.f32 %v1703_v60, %v1718_v6 }
  0xc9   : > { %v840_v1 = vsub.f32 %v1703_v60, %v836_v62  ;;  %v842_v2 = vsub.f32 %v1705_v61, %v836_v62  ;;  %v839_v18 = vsub.f32 %v1703_v60, %v832_v63  ;;  %v841_v22 = vsub.f32 %v1705_v61, %v832_v63  ;;  %v1479_v62 = vld [vmem:[%s501_s16] sm:$0xff]  }
  0xca   : > { %v1044_v8 = vsub.f32 %v1703_v60, %v1040_v0  ;;  %v1046_v5 = vsub.f32 %v1705_v61, %v1040_v0  ;;  %v1043_v26 = vsub.f32 %v1703_v60, %v1036_v3  ;;  %v1045_v30 = vsub.f32 %v1705_v61, %v1036_v3 }
  0xcb   : > { %v844_v11 = vand.u32 2147483647, %v840_v1  ;;  %v846_v12 = vand.u32 2147483647, %v842_v2  ;;  %v843_v25 = vand.u32 2147483647, %v839_v18  ;;  %v809_v54 = vrot.slane %v777_v59, %v1651_v10 }
  0xcc   : > { %v1048_v19 = vand.u32 2147483647, %v1044_v8  ;;  %v1050_v20 = vand.u32 2147483647, %v1046_v5  ;;  %v845_v29 = vand.u32 2147483647, %v841_v22  ;;  %v1009_v63 = vrot.slane %v983_v50, %v1648_v9 }
  0xcd   : > { %v848_v23 = vsub.f32 1.0, %v844_v11  ;;  %v850_v24 = vsub.f32 1.0, %v846_v12  ;;  %v847_v33 = vsub.f32 1.0, %v843_v25  ;;  %v1047_v34 = vand.u32 2147483647, %v1043_v26 }
  0xce   : > { %v1052_v27 = vsub.f32 1.0, %v1048_v19  ;;  %v1054_v28 = vsub.f32 1.0, %v1050_v20  ;;  %v849_v37 = vsub.f32 1.0, %v845_v29  ;;  %v1049_v38 = vand.u32 2147483647, %v1045_v30 }
  0xcf   : > { %v852_v31 = vmax.f32 %v848_v23, 0.0  ;;  %v854_v32 = vmax.f32 %v850_v24, 0.0  ;;  %v851_v40 = vmax.f32 %v847_v33, 0.0  ;;  %v1051_v41 = vsub.f32 1.0, %v1047_v34 }
  0xd0   : > { %v1056_v35 = vmax.f32 %v1052_v27, 0.0  ;;  %v1058_v36 = vmax.f32 %v1054_v28, 0.0  ;;  %v853_v44 = vmax.f32 %v849_v37, 0.0  ;;  %v1053_v45 = vsub.f32 1.0, %v1049_v38 }
  0xd1   : > { %v856_v39 = vpack.c.bf16 %v854_v32, %v852_v31  ;;  %v934_v47 = vmax.f32 %v933_v13, 0.0  ;;  %v1055_v48 = vmax.f32 %v1051_v41, 0.0  ;;  %v928_v49 = vmax.f32 %v927_v7, 0.0 }
  0xd2   : > { %v1060_v43 = vpack.c.bf16 %v1058_v36, %v1056_v35  ;;  %v855_v51 = vpack.c.bf16 %v853_v44, %v851_v40  ;;  %v1057_v52 = vmax.f32 %v1053_v45, 0.0  ;;  %v1433_v55 = vadd.f32 -14.0, %v800_v56  ;;  %v1480_v56 = vld [vmem:[%s506_s26] sm:$0xff]  }
  0xd3   : > { %880 = vmatprep.subr.bf16.mxu0 %v856_v39  ;;  %v1137_v57 = vmax.f32 %v1136_v21, 0.0  ;;  %v1130_v0 = vsub.f32 1.0, %v983_v50  ;;  %v813_v2 = vsub.f32 %v1703_v60, %v809_v54  ;;  %v1013_v3 = vrot.slane %v983_v50, %v1651_v10 }
  0xd4   : > { %1083 = vmatprep.subr.bf16.mxu1 %v1060_v43  ;;  %881 = vmatpush1.bf16.msra.mxu0 %v855_v51  ;;  %v1059_v1 = vpack.c.bf16 %v1057_v52, %v1055_v48  ;;  %v814_v4 = vsub.f32 %v1705_v61, %v1718_v6  ;;  %v935_v59 = vsub.f32 1.0, %v934_v47  ;;  %v929_v8 = vsub.f32 1.0, %v928_v49 }
  0xd5   : > { %v1016_v5 = vsub.f32 %v1703_v60, %v1009_v63  ;;  %v1131_v7 = vmax.f32 %v1130_v0, 0.0  ;;  %v1437_v11 = vadd.f32 -14.0, %v1700_v58  ;;  %v1436_v12 = vadd.f32 -14.0, %v983_v50 }
  0xd6   : > { %1084 = vmatpush1.bf16.msra.mxu1 %v1059_v1  ;;  %v1017_v13 = vsub.f32 %v1703_v60, %v1013_v3  ;;  %v1018_v18 = vsub.f32 %v1705_v61, %v1009_v63  ;;  %v937_v19 = vmax.f32 %v1433_v55, 0.0  ;;  %v931_v6 = vmax.f32 %v1432_v53, 0.0 }
  0xd7   : > { %1431 = vmatmul.mubr.msk.bf16.vlgmr.msra.gmra.mxu0 %vm862_vm3, %v1479_v62  ;;  %v815_v20 = vsub.f32 %v1705_v61, %v809_v54  ;;  %v1138_v21 = vsub.f32 1.0, %v1137_v57  ;;  %v1132_v22 = vsub.f32 1.0, %v1131_v7  ;;  %v1019_v58 = vsub.f32 %v1705_v61, %v1013_v3 }
  0xd8   : > { %v932_v23 = vsub.f32 %v929_v8, %v931_v6  ;;  %v938_v24 = vsub.f32 %v935_v59, %v937_v19  ;;  %v1140_v25 = vmax.f32 %v1437_v11, 0.0  ;;  %v1134_v26 = vmax.f32 %v1436_v12, 0.0 }
  0xd9   : > { %1435 = vmatmul.mubr.msk.bf16.vlgmr.msra.gmra.mxu1 %vm862_vm3, %v1480_v56  ;;  %v816_v30 = vand.u32 2147483647, %v812_v42  ;;  %v818_v31 = vand.u32 2147483647, %v814_v4  ;;  %v1020_v32 = vand.u32 2147483647, %v1016_v5 }
  0xda   : > { %v1751_v27 = vmul.f32 %v938_v24, %v932_v23  ;;  %v1135_v60 = vsub.f32 %v1132_v22, %v1134_v26  ;;  %v1141_v28 = vsub.f32 %v1138_v21, %v1140_v25  ;;  %v817_v33 = vand.u32 2147483647, %v813_v2 }
  0xdb   : > { %v1022_v34 = vand.u32 2147483647, %v1018_v18  ;;  %v819_v35 = vand.u32 2147483647, %v815_v20  ;;  %v1021_v36 = vand.u32 2147483647, %v1017_v13 }
  0xdc   : > { %v1753_v29 = vmul.f32 %v1141_v28, %v1135_v60  ;;  %v1023_v37 = vand.u32 2147483647, %v1019_v58  ;;  %v820_v38 = vsub.f32 1.0, %v816_v30  ;;  %v822_v39 = vsub.f32 1.0, %v818_v31 }
  0xdd   : > { %v1024_v61 = vsub.f32 1.0, %v1020_v32  ;;  %v821_v41 = vsub.f32 1.0, %v817_v33  ;;  %v1026_v43 = vsub.f32 1.0, %v1022_v34  ;;  %v823_v44 = vsub.f32 1.0, %v819_v35 }
  0xde   : > { %v1025_v48 = vsub.f32 1.0, %v1021_v36  ;;  %v1027_v49 = vsub.f32 1.0, %v1023_v37  ;;  %v824_v50 = vmax.f32 %v820_v38, 0.0  ;;  %v826_v42 = vmax.f32 %v822_v39, 0.0 }
  0xdf   : > { %v1028_v51 = vmax.f32 %v1024_v61, 0.0  ;;  %v825_v52 = vmax.f32 %v821_v41, 0.0  ;;  %v1030_v62 = vmax.f32 %v1026_v43, 0.0  ;;  %v827_v63 = vmax.f32 %v823_v44, 0.0 }
  0xe0   : > { %v1029_v1 = vmax.f32 %v1025_v48, 0.0  ;;  %v1031_v4 = vmax.f32 %v1027_v49, 0.0 }
 0x197   : > { %v900_v40 = vpop.f32.mrf.mxu0 }
 0x198   : > { %v909_v55 = vmul.f32 %v900_v40, %v824_v50 }
 0x199   : > { %v1103_v45 = vpop.f32.mrf.mxu1  ;;  %v902_v47 = vpop.f32.mrf.mxu0 }
 0x19a   : > { %v1112_v0 = vmul.f32 %v1103_v45, %v1028_v51  ;;  %v910_v59 = vmul.f32 %v902_v47, %v825_v52 }
 0x19b   : > { %v1105_v53 = vpop.f32.mrf.mxu1  ;;  %v904_v54 = vpop.f32.mrf.mxu0 }
 0x19c   : > { %v911_v57 = vmul.f32 %v904_v54, %v826_v42  ;;  %v1113_v7 = vmul.f32 %v1105_v53, %v1029_v1 }
 0x19d   : > { %v1107_v2 = vpop.f32.mrf.mxu1  ;;  %v906_v3 = vpop.f32.mrf.mxu0 }
 0x19e   : > { %v913_v56 = vadd.f32 %v911_v57, %v909_v55  ;;  %v1114_v8 = vmul.f32 %v1107_v2, %v1030_v62  ;;  %v912_v5 = vmul.f32 %v906_v3, %v827_v63  ;;  %v1201_v57 = vld [vmem:[%s1631_s23] sm:$0x1] }
 0x19f   : > { %v1109_v11 = vpop.f32.mrf.mxu1 }
 0x1a0   : > { %v914_v12 = vrot.slane %v913_v56, 4  ;;  %v1116_v13 = vadd.f32 %v1114_v8, %v1112_v0  ;;  %v920_v18 = vadd.f32 %v912_v5, %v910_v59  ;;  %v1115_v19 = vmul.f32 %v1109_v11, %v1031_v4 }
 0x1a2   : > { %v915_v6 = vadd.f32 %v914_v12, %v913_v56  ;;  %v1117_v20 = vrot.slane %v1116_v13, 4  ;;  %v921_v21 = vrot.slane %v920_v18, 4  ;;  %v1123_v22 = vadd.f32 %v1115_v19, %v1113_v7 }
 0x1a4   : > { %v916_v23 = vrot.slane %v915_v6, 2  ;;  %v1118_v24 = vadd.f32 %v1117_v20, %v1116_v13  ;;  %v922_v58 = vadd.f32 %v921_v21, %v920_v18  ;;  %v1124_v25 = vrot.slane %v1123_v22, 4 }
 0x1a6   : > { %v917_v26 = vadd.f32 %v916_v23, %v915_v6  ;;  %v1119_v60 = vrot.slane %v1118_v24, 2  ;;  %v923_v28 = vrot.slane %v922_v58, 2  ;;  %v1125_v30 = vadd.f32 %v1124_v25, %v1123_v22 }
 0x1a8   : > { %v918_v31 = vrot.slane %v917_v26, 1  ;;  %v1120_v32 = vadd.f32 %v1119_v60, %v1118_v24  ;;  %v924_v33 = vadd.f32 %v923_v28, %v922_v58  ;;  %v1126_v34 = vrot.slane %v1125_v30, 2 }
 0x1aa   : > { %v919_v35 = vadd.f32 %v918_v31, %v917_v26  ;;  %v1121_v36 = vrot.slane %v1120_v32, 1  ;;  %v925_v37 = vrot.slane %v924_v33, 1  ;;  %v1127_v38 = vadd.f32 %v1126_v34, %v1125_v30 }
 0x1ac   : > { %v1122_v39 = vadd.f32 %v1121_v36, %v1120_v32  ;;  %v926_v40 = vadd.f32 %v925_v37, %v924_v33  ;;  %v1128_v61 = vrot.slane %v1127_v38, 1  ;;  %v939_v41 = vsub.f32 %v919_v35, %v1660_v16 }
 0x1ae   : > { %v940_v43 = vsub.f32 %v926_v40, %v1663_v17  ;;  %v1129_v44 = vadd.f32 %v1128_v61, %v1127_v38  ;;  %v1142_v45 = vsub.f32 %v1122_v39, %v1654_v14 }
 0x1b0   : > { %v944_v47 = vcombine.low %v939_v41, %v940_v43  ;;  %v1143_v48 = vsub.f32 %v1129_v44, %v1657_v15 }
 0x1b2   : > { %v951_v49 = vrot.slane %v944_v47, %v1674_v46  ;;  %v1147_v50 = vcombine.low %v1142_v45, %v1143_v48 }
 0x1b4   : > { %v958_v42 = vrot.slane %v951_v49, %v1674_v46  ;;  %v1154_v51 = vrot.slane %v1147_v50, %v1674_v46 }
 0x1b6   : > { %v960_v52 = vmul.f32 %v958_v42, %v1751_v27  ;;  %v1161_v16 = vrot.slane %v1154_v51, %v1674_v46 }
 0x1b8   : > { %v961_v17 = vmul.f32 %v960_v52, %v958_v42  ;;  %v1163_v53 = vmul.f32 %v1161_v16, %v1753_v29 }
 0x1ba   : > { %v1164_v54 = vmul.f32 %v1163_v53, %v1161_v16 }
 0x1bc   : > { %v1165_v14 = vadd.f32 %v1164_v54, %v961_v17 }
 0x1be   : > { %v1170_v55 = vrot.slane %v1165_v14, %v1648_v9  ;;  %v1174_v15 = vrot.slane %v1165_v14, %v1651_v10 }
 0x1c0   : > { %v1179_v62 = vadd.f32 %v1174_v15, %v1170_v55 }
 0x1c2   : > { %v1202_v63 = vadd.f32 %v1201_v57, %v1179_v62 }
 0x1c4   : > { %1203 = vst [vmem:[%s1631_s23] sm:$0x1] %v1202_v63 }
 0x1c5 PF: > { %s22_s19 = sadd.s32 1, %s1511_s19   ;;  %s1790_s17 = smov %s1507_s18 }
 0x1c6   : > { %p19_p5 = scmp.ge.s32.totalorder %s22_s19, 4   ;;  %s1791_s18 = smov %s1793_s20 }
 0x1c8   :  { %21 = sbr.rel (!%p19_p5) target bundleno = 2 (0x2), region = 127 }

// kernel: inverse_consistent_forward.3
= control target key start
LH: loop header
LB: loop body
LE: loop exit
PB: predicated region body
PF: predicated region fallthrough
CT: control target
= control target key end

     0   :  { %s1189_s12 = smov 0   ;;  %s1191_s13 = smov 0   ;;  %s1403_s0 = inlined_call_operand.vmem [shape: bf16[2,64,16], index: 0, kind: input, shape index: {}]   ;;  %s1404_s1 = inlined_call_operand.vmem [shape: f32[2,2,256], index: 1, kind: input, shape index: {}]   ;;  %s1405_s2 = inlined_call_operand.vmem [shape: f32[2,2,256], index: 2, kind: input, shape index: {}]   ;;  %s1406_s3 = inlined_call_operand.vmem [shape: f32[16,128], index: 3, kind: output, shape index: {}]  }
   0x1   :  { %s1193_s14 = smov 0  }
   0x2 LB: > { %s25_s15 = sadd.s32 1, %s1160_s13  ;;  %p1076_p0 = scmp.ge.s32.totalorder %s1164_s14, 1  ;;  %s1164_s14 = sphi %s1193_s14, %s13_s14   ;;  %s1160_s13 = sphi %s1191_s13, %s1408_s13   ;;  %s1156_s12 = sphi %s1189_s12, %s1407_s12  }
   0x3   : > { %p27_p1 = scmp.ge.s32.totalorder %s25_s15, 2  ;;  %p183_p2 = scmp.lt.s32.totalorder %s1164_s14, 3 }
   0x5   : > { %s1410_s15 = smov (%p27_p1, %s25_s15), 0  ;;  %p184_p3 = pnand %p1076_p0, %p183_p2 }
   0x6   : > { %p224_p4 = scmp.lt.s32.totalorder (!%p184_p3), %s1156_s12, 1 }
   0x7   : > { %187 = sbr.rel (%p184_p3) target bundleno = 560 (0x230), region = 32 }
   0xc   : > { %v263_v0 = vlaneseq  ;;  %v1166_v1 = vmov 0   ;;  %s1412_s12 = smov (!%p224_p4, %s1156_s12), 1  ;;  %vm366_vm0 = vcmask 130048  }
   0xd   : > { %411 = vmatprep.mubr.bf16.mxu0 %v1166_v1  ;;  %676 = vmatprep.mubr.bf16.mxu1 %v1166_v1  ;;  %s1104_s16 = sshll.u32 %s1412_s12, 5  ;;  %s1105_s17 = sshll.u32 %s1412_s12, 2 }
   0xe   : > { %s237_s20 = scalar_lea.vmem %s1404_s1, %s1105_s17  ;;  %v1216_v2 = vshrl.u32 %v263_v0, 7  ;;  %s247_s23 = scalar_lea.vmem %s1405_s2, %s1105_s17 }
   0xf   : > { %v268_v3 = vld [vmem:[%s237_s20] ss:$2 sm:$0x3]  ;;  %v1084_v4 = vld [vmem:[%s237_s20 + $0x1] ss:$2 sm:$0x3]  ;;  %s1224_s26 = scalar_lea.vmem %s1403_s0, %s1104_s16 }
  0x10   : > { %v269_v5 = vld [vmem:[%s247_s23] ss:$2 sm:$0x3]  ;;  %v1085_v6 = vld [vmem:[%s247_s23 + $0x1] ss:$2 sm:$0x3]  ;;  %v1239_v14 = vcvt.s32.f32 %v1216_v2 }
  0x11   : > { %v1226_v7 = vadd.f32 %v269_v5, %v268_v3  ;;  %v1228_v8 = vadd.f32 %v1085_v6, %v1084_v4  ;;  %v265_v9 = vadd.s32 8, %v1216_v2  ;;  %v1233_v11 = vsub.s32 1, %v1216_v2  ;;  %v1134_v37 = vld [vmem:[%s1224_s26] sm:$0xff]   ;;  %v1135_v38 = vld [vmem:[%s1224_s26 + $0x8] sm:$0xff]   ;;  %v1136_v39 = vld [vmem:[%s1224_s26 + $0x10] sm:$0xff]   ;;  %s1083_s27 = sshll.u32 %s1412_s12, 3 }
  0x12   : > { %v1236_v13 = vsub.s32 0, %v1216_v2  ;;  %v1137_v40 = vld [vmem:[%s1224_s26 + $0x18] sm:$0xff]   ;;  %s1361_s30 = scalar_lea.vmem %s1406_s3, %s1083_s27 }
  0x13   : > { %v279_v10 = vmul.f32 16.0, %v1228_v8  ;;  %v1241_v15 = vcvt.s32.f32 %v265_v9  ;;  %v276_v41 = vmul.f32 16.0, %v1226_v7 }
  0x15   : > { %v280_v12 = vmax.f32 %v279_v10, 0.0  ;;  %v277_v42 = vmax.f32 %v276_v41, 0.0 }
  0x17   : > { %v281_v16 = vmin.f32 %v280_v12, 15.0  ;;  %v278_v43 = vmin.f32 %v277_v42, 15.0 }
  0x19   : > { %v317_v17 = vrot.slane %v281_v16, %v1233_v11  ;;  %v313_v18 = vrot.slane %v281_v16, %v1236_v13  ;;  %v286_v44 = vrot.slane %v278_v43, %v1236_v13  ;;  %v290_v45 = vrot.slane %v278_v43, %v1233_v11 }
  0x1b   : > { %v321_v19 = vsub.f32 %v1239_v14, %v317_v17  ;;  %v323_v20 = vsub.f32 %v1241_v15, %v317_v17  ;;  %v320_v21 = vsub.f32 %v1239_v14, %v313_v18  ;;  %v322_v22 = vsub.f32 %v1241_v15, %v313_v18 }
  0x1c   : > { %v293_v46 = vsub.f32 %v1239_v14, %v286_v44  ;;  %v294_v47 = vsub.f32 %v1239_v14, %v290_v45  ;;  %v295_v49 = vsub.f32 %v1241_v15, %v286_v44  ;;  %v296_v51 = vsub.f32 %v1241_v15, %v290_v45 }
  0x1d   : > { %v325_v23 = vand.u32 2147483647, %v321_v19  ;;  %v327_v24 = vand.u32 2147483647, %v323_v20  ;;  %v324_v25 = vand.u32 2147483647, %v320_v21 }
  0x1e   : > { %v326_v26 = vand.u32 2147483647, %v322_v22  ;;  %v297_v48 = vand.u32 2147483647, %v293_v46  ;;  %v298_v50 = vand.u32 2147483647, %v294_v47 }
  0x1f   : > { %v329_v27 = vsub.f32 1.0, %v325_v23  ;;  %v331_v28 = vsub.f32 1.0, %v327_v24  ;;  %v328_v29 = vsub.f32 1.0, %v324_v25  ;;  %v299_v53 = vand.u32 2147483647, %v295_v49 }
  0x20   : > { %v330_v30 = vsub.f32 1.0, %v326_v26  ;;  %v301_v52 = vsub.f32 1.0, %v297_v48  ;;  %v302_v54 = vsub.f32 1.0, %v298_v50  ;;  %v300_v55 = vand.u32 2147483647, %v296_v51 }
  0x21   : > { %v333_v31 = vmax.f32 %v329_v27, 0.0  ;;  %v335_v32 = vmax.f32 %v331_v28, 0.0  ;;  %v332_v33 = vmax.f32 %v328_v29, 0.0  ;;  %v303_v57 = vsub.f32 1.0, %v299_v53 }
  0x22   : > { %v334_v34 = vmax.f32 %v330_v30, 0.0  ;;  %v1267_v56 = vmax.f32 %v301_v52, 0.0  ;;  %v1269_v58 = vmax.f32 %v302_v54, 0.0  ;;  %v304_v59 = vsub.f32 1.0, %v300_v55 }
  0x23   : > { %v337_v35 = vpack.c.bf16 %v335_v32, %v333_v31  ;;  %v1272_v62 = vmax.f32 %v303_v57, 0.0  ;;  %v1167_v21 = vmov 1966171168  }
  0x24   : > { %v336_v36 = vpack.c.bf16 %v334_v34, %v332_v33  ;;  %v1275_v3 = vmax.f32 %v304_v59, 0.0  ;;  %v528_v22 = vunpack.c.l.s4 %v1167_v21 }
  0x25   : > { %393 = vmatprep.subr.bf16.mxu0 %v337_v35 }
  0x26   : > { %394 = vmatpush1.bf16.msra.mxu0 %v336_v36  ;;  %v529_v34 = vunpack.c.0.s8 %v528_v22 }
  0x28   : > { %v1287_v46 = vsub.s32 %v529_v34, %v1216_v2 }
  0x29   : > { %1090 = vmatmul.mubr.msk.bf16.vlgmr.msra.gmra.mxu0 %vm366_vm0, %v1134_v37 }
  0x2a   : > { %421 = vmatprep.mubr.bf16.mxu0 %v1166_v1 }
  0x31   : > { %1091 = vmatmul.mubr.msk.bf16.gmra.mxu0 %vm366_vm0, %v1135_v38 }
  0x32   : > { %431 = vmatprep.mubr.bf16.mxu0 %v1166_v1 }
  0x39   : > { %1092 = vmatmul.mubr.msk.bf16.gmra.mxu0 %vm366_vm0, %v1136_v39 }
  0x3a   : > { %441 = vmatprep.mubr.bf16.mxu0 %v1166_v1 }
  0x41   : > { %1093 = vmatmul.mubr.msk.bf16.gmra.mxu0 %vm366_vm0, %v1137_v40 }
  0xe9   : > { %v413_v60 = vpop.f32.mrf.mxu0 }
  0xea   : > { %v452_v61 = vmul.f32 %v413_v60, %v1267_v56 }
  0xeb   : > { %v415_v63 = vpop.f32.mrf.mxu0 }
  0xec   : > { %v453_v0 = vmul.f32 %v415_v63, %v1269_v58 }
  0xed   : > { %v417_v4 = vpop.f32.mrf.mxu0 }
  0xee   : > { %v454_v5 = vmul.f32 %v417_v4, %v1272_v62 }
  0xef   : > { %v419_v6 = vpop.f32.mrf.mxu0 }
  0xf0   : > { %v456_v9 = vadd.f32 %v454_v5, %v452_v61  ;;  %v455_v10 = vmul.f32 %v419_v6, %v1275_v3 }
  0xf1   : > { %v423_v12 = vpop.f32.mrf.mxu0 }
  0xf2   : > { %v457_v16 = vrot.slane %v456_v9, 4  ;;  %v463_v17 = vadd.f32 %v455_v10, %v453_v0  ;;  %v470_v26 = vmul.f32 %v423_v12, %v1267_v56 }
  0xf3   : > { %v425_v18 = vpop.f32.mrf.mxu0 }
  0xf4   : > { %v458_v19 = vadd.f32 %v457_v16, %v456_v9  ;;  %v464_v20 = vrot.slane %v463_v17, 4  ;;  %v471_v28 = vmul.f32 %v425_v18, %v1269_v58 }
  0xf5   : > { %v427_v23 = vpop.f32.mrf.mxu0 }
  0xf6   : > { %v459_v24 = vrot.slane %v458_v19, 2  ;;  %v465_v25 = vadd.f32 %v464_v20, %v463_v17  ;;  %v472_v27 = vmul.f32 %v427_v23, %v1272_v62 }
  0xf7   : > { %v429_v29 = vpop.f32.mrf.mxu0 }
  0xf8   : > { %v460_v30 = vadd.f32 %v459_v24, %v458_v19  ;;  %v466_v31 = vrot.slane %v465_v25, 2  ;;  %v474_v32 = vadd.f32 %v472_v27, %v470_v26  ;;  %v473_v33 = vmul.f32 %v429_v29, %v1275_v3 }
  0xf9   : > { %v433_v35 = vpop.f32.mrf.mxu0 }
  0xfa   : > { %v461_v36 = vrot.slane %v460_v30, 1  ;;  %v467_v37 = vadd.f32 %v466_v31, %v465_v25  ;;  %v475_v38 = vrot.slane %v474_v32, 4  ;;  %v481_v39 = vadd.f32 %v473_v33, %v471_v28 }
  0xfb   : > { %v488_v40 = vmul.f32 %v433_v35, %v1267_v56  ;;  %v435_v41 = vpop.f32.mrf.mxu0 }
  0xfc   : > { %v468_v42 = vrot.slane %v467_v37, 1  ;;  %v476_v43 = vadd.f32 %v475_v38, %v474_v32  ;;  %v482_v44 = vrot.slane %v481_v39, 4  ;;  %v1284_v45 = vadd.f32 %v461_v36, %v460_v30 }
  0xfd   : > { %v489_v47 = vmul.f32 %v435_v41, %v1269_v58  ;;  %v437_v48 = vpop.f32.mrf.mxu0 }
  0xfe   : > { %v1290_v49 = vadd.f32 %v468_v42, %v467_v37  ;;  %v477_v50 = vrot.slane %v476_v43, 2  ;;  %v483_v51 = vadd.f32 %v482_v44, %v481_v39  ;;  %v490_v52 = vmul.f32 %v437_v48, %v1272_v62 }
  0xff   : > { %v439_v53 = vpop.f32.mrf.mxu0 }
 0x100   : > { %v745_v54 = vcombine.low %v1284_v45, %v1290_v49  ;;  %v478_v55 = vadd.f32 %v477_v50, %v476_v43  ;;  %v484_v57 = vrot.slane %v483_v51, 2  ;;  %v492_v59 = vadd.f32 %v490_v52, %v488_v40 }
 0x101   : > { %v491_v60 = vmul.f32 %v439_v53, %v1275_v3  ;;  %v443_v2 = vpop.f32.mrf.mxu0 }
 0x102   : > { %v1297_v61 = vrot.slane %v745_v54, %v1287_v46  ;;  %v479_v63 = vrot.slane %v478_v55, 1  ;;  %v485_v0 = vadd.f32 %v484_v57, %v483_v51  ;;  %v493_v4 = vrot.slane %v492_v59, 4 }
 0x103   : > { %v499_v5 = vadd.f32 %v491_v60, %v489_v47  ;;  %v445_v6 = vpop.f32.mrf.mxu0  ;;  %v506_v16 = vmul.f32 %v443_v2, %v1267_v56 }
 0x104   : > { %v486_v9 = vrot.slane %v485_v0, 1  ;;  %v494_v10 = vadd.f32 %v493_v4, %v492_v59  ;;  %v759_v18 = vrot.slane %v1297_v61, %v1287_v46  ;;  %v1302_v19 = vadd.f32 %v479_v63, %v478_v55 }
 0x105   : > { %v500_v12 = vrot.slane %v499_v5, 4  ;;  %v447_v17 = vpop.f32.mrf.mxu0  ;;  %v507_v24 = vmul.f32 %v445_v6, %v1269_v58 }
 0x106   : > { %v1304_v20 = vadd.f32 %v486_v9, %v485_v0  ;;  %v495_v21 = vrot.slane %v494_v10, 2  ;;  %v508_v22 = vmul.f32 %v447_v17, %v1272_v62 }
 0x107   : > { %v501_v23 = vadd.f32 %v500_v12, %v499_v5  ;;  %v449_v25 = vpop.f32.mrf.mxu0 }
 0x108   : > { %v764_v26 = vcombine.low %v1302_v19, %v1304_v20  ;;  %v496_v27 = vadd.f32 %v495_v21, %v494_v10  ;;  %v510_v56 = vadd.f32 %v508_v22, %v506_v16  ;;  %v509_v28 = vmul.f32 %v449_v25, %v1275_v3 }
 0x109   : > { %v502_v29 = vrot.slane %v501_v23, 2 }
 0x10a   : > { %v771_v30 = vrot.slane %v764_v26, %v1287_v46  ;;  %v511_v31 = vrot.slane %v510_v56, 4  ;;  %v517_v32 = vadd.f32 %v509_v28, %v507_v24  ;;  %v497_v33 = vrot.slane %v496_v27, 1 }
 0x10b   : > { %v503_v34 = vadd.f32 %v502_v29, %v501_v23 }
 0x10c   : > { %v778_v62 = vrot.slane %v771_v30, %v1287_v46  ;;  %v512_v35 = vadd.f32 %v511_v31, %v510_v56  ;;  %v518_v36 = vrot.slane %v517_v32, 4  ;;  %v1314_v40 = vadd.f32 %v497_v33, %v496_v27 }
 0x10d   : > { %v504_v58 = vrot.slane %v503_v34, 1 }
 0x10e   : > { %v513_v37 = vrot.slane %v512_v35, 2  ;;  %v519_v38 = vadd.f32 %v518_v36, %v517_v32  ;;  %v780_v39 = vadd.f32 %v778_v62, %v1228_v8 }
 0x10f   : > { %v1316_v41 = vadd.f32 %v504_v58, %v503_v34 }
 0x110   : > { %v514_v3 = vadd.f32 %v513_v37, %v512_v35  ;;  %v520_v42 = vrot.slane %v519_v38, 2  ;;  %v784_v44 = vmul.f32 16.0, %v780_v39 }
 0x111   : > { %v526_v43 = vcombine.low %v1314_v40, %v1316_v41 }
 0x112   : > { %v515_v47 = vrot.slane %v514_v3, 1  ;;  %v521_v48 = vadd.f32 %v520_v42, %v519_v38  ;;  %v785_v52 = vmax.f32 %v784_v44, 0.0 }
 0x113   : > { %v1321_v50 = vrot.slane %v526_v43, %v1287_v46 }
 0x114   : > { %v522_v51 = vrot.slane %v521_v48, 1  ;;  %v1325_v54 = vadd.f32 %v515_v47, %v514_v3  ;;  %v786_v59 = vmin.f32 %v785_v52, 15.0 }
 0x115   : > { %v540_v53 = vrot.slane %v1321_v50, %v1287_v46 }
 0x116   : > { %v1327_v55 = vadd.f32 %v522_v51, %v521_v48  ;;  %v822_v63 = vrot.slane %v786_v59, %v1233_v11  ;;  %v818_v9 = vrot.slane %v786_v59, %v1236_v13 }
 0x118   : > { %v545_v57 = vcombine.low %v1325_v54, %v1327_v55  ;;  %v826_v5 = vsub.f32 %v1239_v14, %v822_v63  ;;  %v828_v6 = vsub.f32 %v1241_v15, %v822_v63  ;;  %v825_v21 = vsub.f32 %v1239_v14, %v818_v9  ;;  %v1139_v63 = vld [vmem:[%s1224_s26 + $0x8] sm:$0xff]  }
 0x119   : > { %v827_v22 = vsub.f32 %v1241_v15, %v818_v9 }
 0x11a   : > { %v552_v60 = vrot.slane %v545_v57, %v1287_v46  ;;  %v830_v16 = vand.u32 2147483647, %v826_v5  ;;  %v832_v17 = vand.u32 2147483647, %v828_v6  ;;  %v829_v29 = vand.u32 2147483647, %v825_v21 }
 0x11b   : > { %v831_v30 = vand.u32 2147483647, %v827_v22  ;;  %v1168_v5 = vmov 0.0   ;;  %v542_v6 = vadd.f32 %v540_v53, %v1226_v7 }
 0x11c   : > { %v559_v2 = vrot.slane %v552_v60, %v1287_v46  ;;  %v834_v56 = vsub.f32 1.0, %v830_v16  ;;  %v836_v28 = vsub.f32 1.0, %v832_v17  ;;  %v833_v38 = vsub.f32 1.0, %v829_v29  ;;  %v1138_v60 = vld [vmem:[%s1224_s26] sm:$0xff]   ;;  %971 = vst [vmem:[%s1361_s30] sm:$0xff] %v1168_v5 }
 0x11d   : > { %v835_v39 = vsub.f32 1.0, %v831_v30  ;;  %v562_v9 = vmul.f32 16.0, %v542_v6  ;;  %v761_v16 = vadd.f32 %v759_v18, %v1226_v7 }
 0x11e   : > { %v561_v0 = vadd.f32 %v559_v2, %v1228_v8  ;;  %v838_v37 = vmax.f32 %v834_v56, 0.0  ;;  %v840_v44 = vmax.f32 %v836_v28, 0.0  ;;  %v837_v52 = vmax.f32 %v833_v38, 0.0 }
 0x11f   : > { %v839_v57 = vmax.f32 %v835_v39, 0.0 }
 0x120   : > { %v565_v4 = vmul.f32 16.0, %v561_v0  ;;  %v842_v59 = vpack.c.bf16 %v840_v44, %v838_v37  ;;  %v1140_v0 = vld [vmem:[%s1224_s26 + $0x10] sm:$0xff]  }
 0x121   : > { %v841_v2 = vpack.c.bf16 %v839_v57, %v837_v52 }
 0x122   : > { %v566_v10 = vmax.f32 %v565_v4, 0.0  ;;  %v1141_v4 = vld [vmem:[%s1224_s26 + $0x18] sm:$0xff]  }
 0x124   : > { %v567_v12 = vmin.f32 %v566_v10, 15.0  ;;  %v563_v10 = vmax.f32 %v562_v9, 0.0 }
 0x126   : > { %v603_v23 = vrot.slane %v567_v12, %v1233_v11  ;;  %v599_v24 = vrot.slane %v567_v12, %v1236_v13 }
 0x128   : > { %v607_v8 = vsub.f32 %v1239_v14, %v603_v23  ;;  %v609_v25 = vsub.f32 %v1241_v15, %v603_v23  ;;  %v606_v26 = vsub.f32 %v1239_v14, %v599_v24  ;;  %v608_v27 = vsub.f32 %v1241_v15, %v599_v24 }
 0x129   : > { %v781_v23 = vmul.f32 16.0, %v761_v16 }
 0x12a   : > { %v611_v31 = vand.u32 2147483647, %v607_v8  ;;  %v613_v32 = vand.u32 2147483647, %v609_v25  ;;  %v610_v33 = vand.u32 2147483647, %v606_v26 }
 0x12b   : > { %v612_v34 = vand.u32 2147483647, %v608_v27  ;;  %v782_v25 = vmax.f32 %v781_v23, 0.0 }
 0x12c   : > { %v615_v62 = vsub.f32 1.0, %v611_v31  ;;  %v617_v35 = vsub.f32 1.0, %v613_v32  ;;  %v614_v36 = vsub.f32 1.0, %v610_v33 }
 0x12d   : > { %v616_v58 = vsub.f32 1.0, %v612_v34  ;;  %v783_v7 = vmin.f32 %v782_v25, 15.0 }
 0x12e   : > { %v619_v3 = vmax.f32 %v615_v62, 0.0  ;;  %v621_v42 = vmax.f32 %v617_v35, 0.0  ;;  %v618_v43 = vmax.f32 %v614_v36, 0.0 }
 0x12f   : > { %v620_v47 = vmax.f32 %v616_v58, 0.0  ;;  %v791_v33 = vrot.slane %v783_v7, %v1236_v13  ;;  %v795_v37 = vrot.slane %v783_v7, %v1233_v11 }
 0x130   : > { %v623_v48 = vpack.c.bf16 %v621_v42, %v619_v3 }
 0x131   : > { %v622_v51 = vpack.c.bf16 %v620_v47, %v618_v43  ;;  %v798_v43 = vsub.f32 %v1239_v14, %v791_v33  ;;  %v800_v44 = vsub.f32 %v1241_v15, %v791_v33  ;;  %v801_v52 = vsub.f32 %v1241_v15, %v795_v37 }
 0x132   : > { %658 = vmatprep.subr.bf16.mxu1 %v623_v48 }
 0x133   : > { %659 = vmatpush1.bf16.msra.mxu1 %v622_v51 }
 0x134   : > { %877 = vmatprep.subr.bf16.mxu1 %v842_v59 }
 0x136   : > { %1096 = vmatmul.mubr.msk.bf16.vlgmr.msra.gmra.mxu1 %vm366_vm0, %v1138_v60 }
 0x137   : > { %878 = vmatpush1.bf16.msra.mxu1 %v841_v2  ;;  %686 = vmatprep.mubr.bf16.mxu1 %v1166_v1  ;;  %v802_v2 = vand.u32 2147483647, %v798_v43 }
 0x13e   : > { %1097 = vmatmul.mubr.msk.bf16.gmra.mxu1 %vm366_vm0, %v1139_v63 }
 0x13f   : > { %895 = vmatprep.mubr.bf16.mxu1 %v1166_v1 }
 0x146   : > { %1100 = vmatmul.mubr.msk.bf16.vlgmr.msra.gmra.mxu1 %vm366_vm0, %v1140_v0 }
 0x147   : > { %905 = vmatprep.mubr.bf16.mxu1 %v1166_v1  ;;  %v564_v1 = vmin.f32 %v563_v10, 15.0 }
 0x149   : > { %v572_v12 = vrot.slane %v564_v1, %v1236_v13  ;;  %v576_v17 = vrot.slane %v564_v1, %v1233_v11  ;;  %v799_v13 = vsub.f32 %v1239_v14, %v795_v37  ;;  %v804_v11 = vand.u32 2147483647, %v800_v44 }
 0x14a   : > { %v805_v1 = vand.u32 2147483647, %v801_v52 }
 0x14b   : > { %v579_v21 = vsub.f32 %v1239_v14, %v572_v12  ;;  %v581_v22 = vsub.f32 %v1241_v15, %v572_v12  ;;  %v580_v50 = vsub.f32 %v1239_v14, %v576_v17  ;;  %v582_v53 = vsub.f32 %v1241_v15, %v576_v17 }
 0x14c   : > { %v803_v10 = vand.u32 2147483647, %v799_v13  ;;  %v806_v14 = vsub.f32 1.0, %v802_v2  ;;  %v808_v15 = vsub.f32 1.0, %v804_v11 }
 0x14d   : > { %v583_v24 = vand.u32 2147483647, %v579_v21  ;;  %v585_v8 = vand.u32 2147483647, %v581_v22  ;;  %v584_v26 = vand.u32 2147483647, %v580_v50 }
 0x14e   : > { %1101 = vmatmul.mubr.msk.bf16.gmra.mxu1 %vm366_vm0, %v1141_v4  ;;  %v586_v27 = vand.u32 2147483647, %v582_v53  ;;  %v810_v7 = vmax.f32 %v806_v14, 0.0 }
 0x14f   : > { %v587_v56 = vsub.f32 1.0, %v583_v24  ;;  %v589_v28 = vsub.f32 1.0, %v585_v8  ;;  %v588_v61 = vsub.f32 1.0, %v584_v26  ;;  %v807_v8 = vsub.f32 1.0, %v803_v10 }
 0x150   : > { %v590_v18 = vsub.f32 1.0, %v586_v27  ;;  %v809_v26 = vsub.f32 1.0, %v805_v1 }
 0x151   : > { %v591_v30 = vmax.f32 %v587_v56, 0.0  ;;  %v593_v31 = vmax.f32 %v589_v28, 0.0  ;;  %v592_v62 = vmax.f32 %v588_v61, 0.0  ;;  %v812_v61 = vmax.f32 %v808_v15, 0.0 }
 0x152   : > { %v594_v36 = vmax.f32 %v590_v18, 0.0 }
 0x1f6   : > { %v678_v46 = vpop.f32.mrf.mxu1 }
 0x1f7   : > { %v697_v34 = vmul.f32 %v678_v46, %v591_v30 }
 0x1f8   : > { %v680_v29 = vpop.f32.mrf.mxu1 }
 0x1f9   : > { %v698_v38 = vmul.f32 %v680_v29, %v592_v62 }
 0x1fa   : > { %v682_v32 = vpop.f32.mrf.mxu1 }
 0x1fb   : > { %v699_v35 = vmul.f32 %v682_v32, %v593_v31 }
 0x1fc   : > { %v684_v58 = vpop.f32.mrf.mxu1 }
 0x1fd   : > { %v701_v39 = vadd.f32 %v699_v35, %v697_v34  ;;  %v700_v3 = vmul.f32 %v684_v58, %v594_v36  ;;  %v811_v34 = vmax.f32 %v807_v8, 0.0  ;;  %v813_v35 = vmax.f32 %v809_v26, 0.0 }
 0x1fe   : > { %v688_v42 = vpop.f32.mrf.mxu1 }
 0x1ff   : > { %v702_v47 = vrot.slane %v701_v39, 4  ;;  %v708_v48 = vadd.f32 %v700_v3, %v698_v38  ;;  %v715_v4 = vmul.f32 %v688_v42, %v591_v30 }
 0x200   : > { %v690_v51 = vpop.f32.mrf.mxu1 }
 0x201   : > { %v703_v57 = vadd.f32 %v702_v47, %v701_v39  ;;  %v709_v59 = vrot.slane %v708_v48, 4  ;;  %v716_v6 = vmul.f32 %v690_v51, %v592_v62 }
 0x202   : > { %v692_v60 = vpop.f32.mrf.mxu1 }
 0x203   : > { %v704_v63 = vrot.slane %v703_v57, 2  ;;  %v710_v0 = vadd.f32 %v709_v59, %v708_v48  ;;  %v717_v5 = vmul.f32 %v692_v60, %v593_v31 }
 0x204   : > { %v694_v9 = vpop.f32.mrf.mxu1 }
 0x205   : > { %v705_v12 = vadd.f32 %v704_v63, %v703_v57  ;;  %v711_v16 = vrot.slane %v710_v0, 2  ;;  %v719_v17 = vadd.f32 %v717_v5, %v715_v4  ;;  %v718_v21 = vmul.f32 %v694_v9, %v594_v36 }
 0x206   : > { %v897_v22 = vpop.f32.mrf.mxu1 }
 0x207   : > { %v706_v23 = vrot.slane %v705_v12, 1  ;;  %v712_v50 = vadd.f32 %v711_v16, %v710_v0  ;;  %v720_v53 = vrot.slane %v719_v17, 4  ;;  %v726_v24 = vadd.f32 %v718_v21, %v716_v6 }
 0x208   : > { %v899_v25 = vpop.f32.mrf.mxu1  ;;  %v916_v33 = vmul.f32 %v897_v22, %v810_v7 }
 0x209   : > { %v707_v27 = vadd.f32 %v706_v23, %v705_v12  ;;  %v713_v56 = vrot.slane %v712_v50, 1  ;;  %v721_v28 = vadd.f32 %v720_v53, %v719_v17  ;;  %v727_v46 = vrot.slane %v726_v24, 4 }
 0x20a   : > { %v901_v18 = vpop.f32.mrf.mxu1  ;;  %v917_v39 = vmul.f32 %v899_v25, %v811_v34 }
 0x20b   : > { %v733_v29 = vadd.f32 %v707_v27, %v1314_v40  ;;  %v714_v30 = vadd.f32 %v713_v56, %v712_v50  ;;  %v722_v31 = vrot.slane %v721_v28, 2  ;;  %v728_v32 = vadd.f32 %v727_v46, %v726_v24 }
 0x20c   : > { %v918_v62 = vmul.f32 %v901_v18, %v812_v61  ;;  %v903_v36 = vpop.f32.mrf.mxu1 }
 0x20d   : > { %v734_v58 = vadd.f32 %v714_v30, %v1316_v41  ;;  %v723_v37 = vadd.f32 %v722_v31, %v721_v28  ;;  %v729_v38 = vrot.slane %v728_v32, 2  ;;  %v919_v42 = vmul.f32 %v903_v36, %v813_v35 }
 0x20e   : > { %v920_v3 = vadd.f32 %v918_v62, %v916_v33  ;;  %v907_v43 = vpop.f32.mrf.mxu1  ;;  %v737_v0 = vmul.f32 %v733_v29, %v733_v29 }
 0x20f   : > { %v724_v44 = vrot.slane %v723_v37, 1  ;;  %v730_v47 = vadd.f32 %v729_v38, %v728_v32  ;;  %v927_v40 = vadd.f32 %v919_v42, %v917_v39  ;;  %v934_v41 = vmul.f32 %v907_v43, %v810_v7  ;;  %v972_v42 = vld [vmem:[%s1361_s30] sm:$0x1] }
 0x210   : > { %v921_v48 = vrot.slane %v920_v3, 4  ;;  %v909_v51 = vpop.f32.mrf.mxu1  ;;  %v738_v17 = vmul.f32 %v734_v58, %v734_v58 }
 0x211   : > { %v725_v13 = vadd.f32 %v724_v44, %v723_v37  ;;  %v731_v52 = vrot.slane %v730_v47, 1  ;;  %v928_v59 = vrot.slane %v927_v40, 4  ;;  %v935_v6 = vmul.f32 %v909_v51, %v811_v34 }
 0x212   : > { %v922_v57 = vadd.f32 %v921_v48, %v920_v3  ;;  %v911_v60 = vpop.f32.mrf.mxu1 }
 0x213   : > { %v735_v2 = vadd.f32 %v725_v13, %v1325_v54  ;;  %v732_v11 = vadd.f32 %v731_v52, %v730_v47  ;;  %v936_v63 = vmul.f32 %v911_v60, %v812_v61  ;;  %v929_v5 = vadd.f32 %v928_v59, %v927_v40 }
 0x214   : > { %v923_v4 = vrot.slane %v922_v57, 2  ;;  %v913_v9 = vpop.f32.mrf.mxu1 }
 0x215   : > { %v739_v10 = vmul.f32 %v735_v2, %v735_v2  ;;  %v736_v1 = vadd.f32 %v732_v11, %v1327_v55  ;;  %v938_v12 = vadd.f32 %v936_v63, %v934_v41  ;;  %v937_v16 = vmul.f32 %v913_v9, %v813_v35 }
 0x216   : > { %v924_v21 = vadd.f32 %v923_v4, %v922_v57  ;;  %v930_v14 = vrot.slane %v929_v5, 2 }
 0x217   : > { %v741_v22 = vadd.f32 %v739_v10, %v737_v0  ;;  %v740_v15 = vmul.f32 %v736_v1, %v736_v1  ;;  %v939_v23 = vrot.slane %v938_v12, 4  ;;  %v945_v54 = vadd.f32 %v937_v16, %v935_v6 }
 0x218   : > { %v925_v50 = vrot.slane %v924_v21, 1  ;;  %v931_v53 = vadd.f32 %v930_v14, %v929_v5 }
 0x219   : > { %v742_v24 = vadd.f32 %v740_v15, %v738_v17  ;;  %v940_v8 = vadd.f32 %v939_v23, %v938_v12  ;;  %v946_v25 = vrot.slane %v945_v54, 4 }
 0x21a   : > { %v926_v26 = vadd.f32 %v925_v50, %v924_v21  ;;  %v932_v27 = vrot.slane %v931_v53, 1 }
 0x21b   : > { %v941_v56 = vrot.slane %v940_v8, 2  ;;  %v947_v28 = vadd.f32 %v946_v25, %v945_v54 }
 0x21c   : > { %v952_v55 = vadd.f32 %v926_v26, %v1284_v45  ;;  %v933_v46 = vadd.f32 %v932_v27, %v931_v53 }
 0x21d   : > { %v942_v7 = vadd.f32 %v941_v56, %v940_v8  ;;  %v948_v61 = vrot.slane %v947_v28, 2 }
 0x21e   : > { %v956_v18 = vmul.f32 %v952_v55, %v952_v55  ;;  %v953_v29 = vadd.f32 %v933_v46, %v1290_v49 }
 0x21f   : > { %v943_v30 = vrot.slane %v942_v7, 1  ;;  %v949_v31 = vadd.f32 %v948_v61, %v947_v28 }
 0x220   : > { %v958_v32 = vadd.f32 %v956_v18, %v741_v22  ;;  %v957_v33 = vmul.f32 %v953_v29, %v953_v29 }
 0x221   : > { %v944_v34 = vadd.f32 %v943_v30, %v942_v7  ;;  %v950_v62 = vrot.slane %v949_v31, 1 }
 0x222   : > { %v959_v35 = vadd.f32 %v957_v33, %v742_v24 }
 0x223   : > { %v954_v36 = vadd.f32 %v944_v34, %v1302_v19  ;;  %v951_v58 = vadd.f32 %v950_v62, %v949_v31 }
 0x225   : > { %v960_v37 = vmul.f32 %v954_v36, %v954_v36  ;;  %v955_v45 = vadd.f32 %v951_v58, %v1304_v20 }
 0x227   : > { %v962_v38 = vadd.f32 %v960_v37, %v958_v32  ;;  %v961_v39 = vmul.f32 %v955_v45, %v955_v45 }
 0x229   : > { %v963_v3 = vadd.f32 %v961_v39, %v959_v35 }
 0x22b   : > { %v966_v43 = vadd.f32 %v963_v3, %v962_v38 }
 0x22d   : > { %v973_v49 = vadd.f32 %v972_v42, %v966_v43 }
 0x22f   : > { %974 = vst [vmem:[%s1361_s30] sm:$0x1] %v973_v49 }
 0x230 PF: > { %s13_s14 = sadd.s32 1, %s1164_s14   ;;  %s1407_s12 = smov %s1160_s13 }
 0x231   : > { %p10_p5 = scmp.ge.s32.totalorder %s13_s14, 4   ;;  %s1408_s13 = smov %s1410_s15 }
 0x233   :  { %12 = sbr.rel (!%p10_p5) target bundleno = 2 (0x2), region = 74 }

</bundles_post_ra>
